<compile_context>
chip_gen: v7x
topology: tpu7x:2x2x1
jax: 0.10.0
libtpu: 0.0.40
codegen_flags: <defaults>
</compile_context>

<pallas_src>
import functools
import math

import numpy as np
import jax
import jax.numpy as jnp
from jax.experimental import pallas as pl
from jax.experimental.pallas import tpu as pltpu


# ----------------------------------------------------------------------------
# Per-example math (shared by the Pallas kernel and the pure-JAX reference).
# All arrays here are per-batch-element: x/char (S,H), mask_row (1,S).
# ----------------------------------------------------------------------------
def _layernorm(x, gamma, beta, eps=1e-6):
    mu = jnp.mean(x, axis=-1, keepdims=True)
    var = jnp.mean(jnp.square(x - mu), axis=-1, keepdims=True)
    return (x - mu) * jax.lax.rsqrt(var + eps) * gamma + beta


def _mha(xn, bias_row, w_qkv, b_qkv, w_o, b_o, h, dk):
    """Multi-head attention. w_qkv: (H, 3H) fused Q|K|V, bf16. bias_row: (1,S) additive."""
    S, H = xn.shape
    qkv = jnp.dot(xn.astype(w_qkv.dtype), w_qkv,
                  preferred_element_type=jnp.float32) + b_qkv          # (S, 3H) f32
    q = qkv[:, 0 * H:1 * H].reshape(S, h, dk).transpose(1, 0, 2)       # (h, S, dk)
    k = qkv[:, 1 * H:2 * H].reshape(S, h, dk).transpose(1, 0, 2)
    v = qkv[:, 2 * H:3 * H].reshape(S, h, dk).transpose(1, 0, 2).astype(w_qkv.dtype)

    scores = jnp.einsum("hsk,htk->hst", q.astype(w_qkv.dtype), k.astype(w_qkv.dtype),
                        preferred_element_type=jnp.float32)
    scores = scores * (1.0 / math.sqrt(dk)) + bias_row[None]           # additive key mask
    scores = scores - jnp.max(scores, axis=-1, keepdims=True)
    p = jnp.exp(scores)
    p = p / jnp.sum(p, axis=-1, keepdims=True)

    ctx = jnp.einsum("hst,htk->hsk", p.astype(v.dtype), v,
                     preferred_element_type=jnp.float32)               # (h, S, dk)
    ctx = ctx.transpose(1, 0, 2).reshape(S, H)                         # concat heads
    return jnp.dot(ctx.astype(w_o.dtype), w_o,
                   preferred_element_type=jnp.float32) + b_o           # (S, H)


def _combination(xn, char_raw, w_qk, b_qk, w_v, b_v, w_o, b_o, h, dk):
    """Gated (2-way softmax) head-wise combination of word (key) and char (value)."""
    S, H = xn.shape
    qk = jnp.dot(xn.astype(w_qk.dtype), w_qk,
                 preferred_element_type=jnp.float32) + b_qk            # (S, 2H)
    v = jnp.dot(char_raw.astype(w_v.dtype), w_v,
                preferred_element_type=jnp.float32) + b_v              # (S, H)
    q3 = qk[:, :H].reshape(S, h, dk)
    k3 = qk[:, H:].reshape(S, h, dk)
    v3 = v.reshape(S, h, dk)

    inv = 1.0 / math.sqrt(dk)
    s_k = jnp.sum(q3 * k3, axis=-1, keepdims=True) * inv               # (S, h, 1)
    s_v = jnp.sum(q3 * v3, axis=-1, keepdims=True) * inv
    m = jnp.maximum(s_k, s_v)
    e_k = jnp.exp(s_k - m)
    e_v = jnp.exp(s_v - m)
    comb = (e_k * k3 + e_v * v3) / (e_k + e_v)                         # (S, h, dk)
    comb = comb.reshape(S, H)
    return jnp.dot(comb.astype(w_o.dtype), w_o,
                   preferred_element_type=jnp.float32) + b_o


def _conv1d_seq(xn, mask_row, w_conv, b_conv):
    """Kernel-size-3 'same' Conv1d along the sequence; padded positions zeroed.

    Shift + mask are fused into (S,S) selection matrices and driven through the MXU
    (avoids pltpu.roll, whose shift must be non-negative)."""
    S, H = xn.shape
    row_i = jax.lax.broadcasted_iota(jnp.int32, (S, S), 0)
    col_i = jax.lax.broadcasted_iota(jnp.int32, (S, S), 1)
    col_m = jnp.broadcast_to(mask_row, (S, S))                         # [r, c] = mask[c]
    sel_prev = jnp.where(row_i == col_i + 1, col_m, 0.0)               # picks mask[s-1]*x[s-1]
    sel_cur = jnp.where(row_i == col_i, col_m, 0.0)                    # picks mask[s]*x[s]
    sel_next = jnp.where(row_i == col_i - 1, col_m, 0.0)               # picks mask[s+1]*x[s+1]

    x_prev = jnp.dot(sel_prev, xn, preferred_element_type=jnp.float32)
    x_cur = jnp.dot(sel_cur, xn, preferred_element_type=jnp.float32)
    x_next = jnp.dot(sel_next, xn, preferred_element_type=jnp.float32)

    y = (jnp.dot(x_prev.astype(w_conv.dtype), w_conv[0], preferred_element_type=jnp.float32)
         + jnp.dot(x_cur.astype(w_conv.dtype), w_conv[1], preferred_element_type=jnp.float32)
         + jnp.dot(x_next.astype(w_conv.dtype), w_conv[2], preferred_element_type=jnp.float32))
    return y + b_conv


def _ffn(xn, w1, b1, w2, b2):
    hdn = jnp.dot(xn.astype(w1.dtype), w1, preferred_element_type=jnp.float32) + b1
    hdn = jax.nn.gelu(hdn)
    return jnp.dot(hdn.astype(w2.dtype), w2, preferred_element_type=jnp.float32) + b2


def _forward_one(x, char, mask_row, tmask_row, w, *, h, dk, is_tree):
    if is_tree:
        (w_attn_qkv, b_attn_qkv, w_attn_o, b_attn_o,
         w_comb_qk, b_comb_qk, w_comb_v, b_comb_v, w_comb_o, b_comb_o,
         ln_g, ln_b, w_ff1, b_ff1, w_ff2, b_ff2) = w
    else:
        (w_attn_qkv, b_attn_qkv, w_attn_o, b_attn_o,
         w_comb_qk, b_comb_qk, w_comb_v, b_comb_v, w_comb_o, b_comb_o,
         ln_g, ln_b, w_conv, b_conv) = w

    bias_row = (mask_row - 1.0) * 1e9          # additive key mask, computed once

    # sublayer1: x + MHA(LN(x))
    xn = _layernorm(x, ln_g[0:1], ln_b[0:1])
    x = x + _mha(xn, bias_row, w_attn_qkv, b_attn_qkv, w_attn_o, b_attn_o, h, dk)

    # sublayer2: x + Combination(LN(x), LN(x), charEm)
    xn = _layernorm(x, ln_g[1:2], ln_b[1:2])
    x = x + _combination(xn, char, w_comb_qk, b_comb_qk, w_comb_v, b_comb_v,
                         w_comb_o, b_comb_o, h, dk)

    if is_tree:
        tbias_row = (tmask_row - 1.0) * 1e9
        xn = _layernorm(x, ln_g[2:3], ln_b[2:3])
        x = x + _mha(xn, tbias_row, w_attn_qkv, b_attn_qkv, w_attn_o, b_attn_o, h, dk)
        xn = _layernorm(x, ln_g[3:4], ln_b[3:4])
        x = x + _ffn(xn, w_ff1, b_ff1, w_ff2, b_ff2)
    else:
        xn = _layernorm(x, ln_g[2:3], ln_b[2:3])
        x = x + _conv1d_seq(xn, mask_row, w_conv, b_conv)

    # final nn.Dropout: identity in eval mode.
    return x


# ----------------------------------------------------------------------------
# Weight bookkeeping: only the weights the selected branch needs are passed.
# ----------------------------------------------------------------------------
_COMMON = ("w_attn_qkv", "b_attn_qkv", "w_attn_o", "b_attn_o",
           "w_comb_qk", "b_comb_qk", "w_comb_v", "b_comb_v", "w_comb_o", "b_comb_o",
           "ln_g", "ln_b")
_TREE_ONLY = ("w_ff1", "b_ff1", "w_ff2", "b_ff2")
_CONV_ONLY = ("w_conv", "b_conv")


def _select_weights(params, is_tree):
    names = _COMMON + (_TREE_ONLY if is_tree else _CONV_ONLY)
    return tuple(params[n] for n in names)


# ----------------------------------------------------------------------------
# Pallas kernel: one grid step processes one batch element entirely in VMEM.
# ----------------------------------------------------------------------------
def _block_kernel(*refs, h, dk, is_tree, n_data):
    data_refs = refs[:n_data]
    w_refs = refs[n_data:-1]
    o_ref = refs[-1]

    if is_tree:
        x_ref, char_ref, mrow_ref, trow_ref = data_refs
        trow = trow_ref[...]
    else:
        x_ref, char_ref, mrow_ref = data_refs
        trow = None

    w = tuple(r[...] for r in w_refs)
    out = _forward_one(x_ref[...], char_ref[...], mrow_ref[...], trow, w,
                       h=h, dk=dk, is_tree=is_tree)
    o_ref[...] = out.astype(o_ref.dtype)


def _const_map(nd):
    return lambda b: (0,) * nd


def transformer_block(x, mask, charEm, params, *, attn_heads,
                      treemask=None, is_tree=False):
    B, S, H = x.shape
    dk = H // attn_heads

    mrow = mask.astype(jnp.float32).reshape(B, 1, S)

    data = [x.astype(jnp.float32), charEm.astype(jnp.float32), mrow]
    data_specs = [
        pl.BlockSpec((None, S, H), lambda b: (b, 0, 0)),
        pl.BlockSpec((None, S, H), lambda b: (b, 0, 0)),
        pl.BlockSpec((None, 1, S), lambda b: (b, 0, 0)),
    ]
    if is_tree:
        tmask = mask if treemask is None else treemask
        data.append(tmask.astype(jnp.float32).reshape(B, 1, S))
        data_specs.append(pl.BlockSpec((None, 1, S), lambda b: (b, 0, 0)))

    w = _select_weights(params, is_tree)
    # Constant index maps -> weight blocks are fetched once and stay resident.
    w_specs = [pl.BlockSpec(a.shape, _const_map(a.ndim)) for a in w]

    kernel = functools.partial(_block_kernel, h=attn_heads, dk=dk,
                               is_tree=is_tree, n_data=len(data))
    return pl.pallas_call(
        kernel,
        out_shape=jax.ShapeDtypeStruct((B, S, H), jnp.float32),
        grid_spec=pltpu.PrefetchScalarGridSpec(
            num_scalar_prefetch=0,
            grid=(B,),
            in_specs=data_specs + w_specs,
            out_specs=pl.BlockSpec((None, S, H), lambda b: (b, 0, 0)),
        ),
        compiler_params=pltpu.CompilerParams(
            dimension_semantics=("parallel",),        # batch steps are independent
            vmem_limit_bytes=48 * 1024 * 1024,        # headroom below v7x's 64 MiB
        ),
    )(*data, *w)


# ----------------------------------------------------------------------------
# Pure-JAX reference (same math, vmapped over the batch).
# ----------------------------------------------------------------------------
def reference_forward(x, mask, charEm, params, *, attn_heads,
                      treemask=None, is_tree=False):
    B, S, H = x.shape
    dk = H // attn_heads
    w = _select_weights(params, is_tree)
    mrow = mask.astype(jnp.float32).reshape(B, 1, S)
    xf = x.astype(jnp.float32)
    cf = charEm.astype(jnp.float32)
    if is_tree:
        tmask = mask if treemask is None else treemask
        trow = tmask.astype(jnp.float32).reshape(B, 1, S)
        fn = lambda x1, c1, mr, tr: _forward_one(
            x1, c1, mr, tr, w, h=attn_heads, dk=dk, is_tree=True)
        return jax.vmap(fn)(xf, cf, mrow, trow)
    fn = lambda x1, c1, mr: _forward_one(
        x1, c1, mr, None, w, h=attn_heads, dk=dk, is_tree=False)
    return jax.vmap(fn)(xf, cf, mrow)


# ----------------------------------------------------------------------------
# Deterministic parameter initialization (synthetic; shapes follow the module).
# Matmul weights are stored in bf16 (MXU inputs); biases / LN params stay f32.
# ----------------------------------------------------------------------------
def init_params(key, H, h, FF):
    keys = iter(jax.random.split(key, 24))
    mm_dtype = jnp.bfloat16

    def lin_w(n_in, n_out):
        s = 1.0 / float(np.sqrt(n_in))
        return jax.random.uniform(next(keys), (n_in, n_out), jnp.float32,
                                  -s, s).astype(mm_dtype)

    def lin_b(n_out, n_in):
        s = 1.0 / float(np.sqrt(n_in))
        return jax.random.uniform(next(keys), (1, n_out), jnp.float32, -s, s)

    s_conv = 1.0 / float(np.sqrt(3 * H))
    params = {
        # fused Q|K|V projection: one (H, 3H) matmul instead of 3*h small ones
        "w_attn_qkv": lin_w(H, 3 * H), "b_attn_qkv": lin_b(3 * H, H),
        "w_attn_o": lin_w(H, H), "b_attn_o": lin_b(H, H),
        # combination: fused Q|K from the word stream, V from the char stream
        "w_comb_qk": lin_w(H, 2 * H), "b_comb_qk": lin_b(2 * H, H),
        "w_comb_v": lin_w(H, H), "b_comb_v": lin_b(H, H),
        "w_comb_o": lin_w(H, H), "b_comb_o": lin_b(H, H),
        "ln_g": jnp.ones((4, H), jnp.float32),
        "ln_b": jnp.zeros((4, H), jnp.float32),
        "w_ff1": lin_w(H, FF), "b_ff1": lin_b(FF, H),
        "w_ff2": lin_w(FF, H), "b_ff2": lin_b(H, FF),
        "w_conv": jax.random.uniform(next(keys), (3, H, H), jnp.float32,
                                     -s_conv, s_conv).astype(mm_dtype),
        "b_conv": jax.random.uniform(next(keys), (1, H), jnp.float32,
                                     -s_conv, s_conv),
    }
    return params


if __name__ == "__main__":
    B, S, H, heads, FF = 2, 8, 32, 4, 128   # feed_forward_hidden = 4 * hidden

    key = jax.random.PRNGKey(0)
    kx, kc, kp = jax.random.split(key, 3)
    x = jax.random.normal(kx, (B, S, H), jnp.float32)
    charEm = jax.random.normal(kc, (B, S, H), jnp.float32)
    mask = jnp.array([[1] * S, [1] * (S - 2) + [0] * 2], dtype=jnp.int32)
    params = init_params(kp, H, heads, FF)

    # isTree=False path (default forward): attention -> combination -> conv.
    out = transformer_block(x, mask, charEm, params, attn_heads=heads, is_tree=False)
    out = jax.block_until_ready(out)
    ref = reference_forward(x, mask, charEm, params, attn_heads=heads, is_tree=False)
    np.testing.assert_allclose(np.asarray(out), np.asarray(ref), rtol=2e-3, atol=2e-3)

    # isTree=True path: attention -> combination -> attention(treemask) -> FFN.
    out_t = transformer_block(x, mask, charEm, params, attn_heads=heads,
                              treemask=mask, is_tree=True)
    out_t = jax.block_until_ready(out_t)
    ref_t = reference_forward(x, mask, charEm, params, attn_heads=heads,
                              treemask=mask, is_tree=True)
    np.testing.assert_allclose(np.asarray(out_t), np.asarray(ref_t),
                               rtol=2e-3, atol=2e-3)

    print("KERNEL_OK")
</pallas_src>

<mosaic_0001>
module attributes {stable_mosaic.version = 11 : i64} {
  func.func @_block_kernel(%arg0: i32, %arg1: memref<1x8x32xf32, #tpu.memory_space<vmem>>, %arg2: memref<1x8x32xf32, #tpu.memory_space<vmem>>, %arg3: memref<1x1x8xf32, #tpu.memory_space<vmem>>, %arg4: memref<32x96xbf16, #tpu.memory_space<vmem>>, %arg5: memref<1x96xf32, #tpu.memory_space<vmem>>, %arg6: memref<32x32xbf16, #tpu.memory_space<vmem>>, %arg7: memref<1x32xf32, #tpu.memory_space<vmem>>, %arg8: memref<32x64xbf16, #tpu.memory_space<vmem>>, %arg9: memref<1x64xf32, #tpu.memory_space<vmem>>, %arg10: memref<32x32xbf16, #tpu.memory_space<vmem>>, %arg11: memref<1x32xf32, #tpu.memory_space<vmem>>, %arg12: memref<32x32xbf16, #tpu.memory_space<vmem>>, %arg13: memref<1x32xf32, #tpu.memory_space<vmem>>, %arg14: memref<4x32xf32, #tpu.memory_space<vmem>>, %arg15: memref<4x32xf32, #tpu.memory_space<vmem>>, %arg16: memref<3x32x32xbf16, #tpu.memory_space<vmem>>, %arg17: memref<1x32xf32, #tpu.memory_space<vmem>>, %arg18: memref<1x8x32xf32, #tpu.memory_space<vmem>>) attributes {dimension_semantics = [#tpu.dimension_semantics<parallel>], iteration_bounds = array<i64: 2>, scalar_prefetch = 0 : i64, scratch_operands = 0 : i64, tpu.core_type = #tpu.core_type<tc>, window_params = [{transform_indices = @transform_0, window_bounds = array<i64: 1, 8, 32>}, {transform_indices = @transform_1, window_bounds = array<i64: 1, 8, 32>}, {transform_indices = @transform_2, window_bounds = array<i64: 1, 1, 8>}, {pipeline_mode = #tpu.pipeline_mode<synchronous>, transform_indices = @transform_3, window_bounds = array<i64: 32, 96>}, {pipeline_mode = #tpu.pipeline_mode<synchronous>, transform_indices = @transform_4, window_bounds = array<i64: 1, 96>}, {pipeline_mode = #tpu.pipeline_mode<synchronous>, transform_indices = @transform_5, window_bounds = array<i64: 32, 32>}, {pipeline_mode = #tpu.pipeline_mode<synchronous>, transform_indices = @transform_6, window_bounds = array<i64: 1, 32>}, {pipeline_mode = #tpu.pipeline_mode<synchronous>, transform_indices = @transform_7, window_bounds = array<i64: 32, 64>}, {pipeline_mode = #tpu.pipeline_mode<synchronous>, transform_indices = @transform_8, window_bounds = array<i64: 1, 64>}, {pipeline_mode = #tpu.pipeline_mode<synchronous>, transform_indices = @transform_9, window_bounds = array<i64: 32, 32>}, {pipeline_mode = #tpu.pipeline_mode<synchronous>, transform_indices = @transform_10, window_bounds = array<i64: 1, 32>}, {pipeline_mode = #tpu.pipeline_mode<synchronous>, transform_indices = @transform_11, window_bounds = array<i64: 32, 32>}, {pipeline_mode = #tpu.pipeline_mode<synchronous>, transform_indices = @transform_12, window_bounds = array<i64: 1, 32>}, {pipeline_mode = #tpu.pipeline_mode<synchronous>, transform_indices = @transform_13, window_bounds = array<i64: 4, 32>}, {pipeline_mode = #tpu.pipeline_mode<synchronous>, transform_indices = @transform_14, window_bounds = array<i64: 4, 32>}, {pipeline_mode = #tpu.pipeline_mode<synchronous>, transform_indices = @transform_15, window_bounds = array<i64: 3, 32, 32>}, {pipeline_mode = #tpu.pipeline_mode<synchronous>, transform_indices = @transform_16, window_bounds = array<i64: 1, 32>}, {transform_indices = @transform_17, window_bounds = array<i64: 1, 8, 32>}]} {
    %c0 = arith.constant 0 : index
    %c0_0 = arith.constant 0 : index
    %0 = vector.load %arg4[%c0, %c0_0] : memref<32x96xbf16, #tpu.memory_space<vmem>>, vector<32x96xbf16>
    %c0_1 = arith.constant 0 : index
    %c0_2 = arith.constant 0 : index
    %1 = vector.load %arg5[%c0_1, %c0_2] : memref<1x96xf32, #tpu.memory_space<vmem>>, vector<1x96xf32>
    %c0_3 = arith.constant 0 : index
    %c0_4 = arith.constant 0 : index
    %2 = vector.load %arg6[%c0_3, %c0_4] : memref<32x32xbf16, #tpu.memory_space<vmem>>, vector<32x32xbf16>
    %c0_5 = arith.constant 0 : index
    %c0_6 = arith.constant 0 : index
    %3 = vector.load %arg7[%c0_5, %c0_6] : memref<1x32xf32, #tpu.memory_space<vmem>>, vector<1x32xf32>
    %c0_7 = arith.constant 0 : index
    %c0_8 = arith.constant 0 : index
    %4 = vector.load %arg8[%c0_7, %c0_8] : memref<32x64xbf16, #tpu.memory_space<vmem>>, vector<32x64xbf16>
    %c0_9 = arith.constant 0 : index
    %c0_10 = arith.constant 0 : index
    %5 = vector.load %arg9[%c0_9, %c0_10] : memref<1x64xf32, #tpu.memory_space<vmem>>, vector<1x64xf32>
    %c0_11 = arith.constant 0 : index
    %c0_12 = arith.constant 0 : index
    %6 = vector.load %arg10[%c0_11, %c0_12] : memref<32x32xbf16, #tpu.memory_space<vmem>>, vector<32x32xbf16>
    %c0_13 = arith.constant 0 : index
    %c0_14 = arith.constant 0 : index
    %7 = vector.load %arg11[%c0_13, %c0_14] : memref<1x32xf32, #tpu.memory_space<vmem>>, vector<1x32xf32>
    %c0_15 = arith.constant 0 : index
    %c0_16 = arith.constant 0 : index
    %8 = vector.load %arg12[%c0_15, %c0_16] : memref<32x32xbf16, #tpu.memory_space<vmem>>, vector<32x32xbf16>
    %c0_17 = arith.constant 0 : index
    %c0_18 = arith.constant 0 : index
    %9 = vector.load %arg13[%c0_17, %c0_18] : memref<1x32xf32, #tpu.memory_space<vmem>>, vector<1x32xf32>
    %c0_19 = arith.constant 0 : index
    %c0_20 = arith.constant 0 : index
    %10 = vector.load %arg14[%c0_19, %c0_20] : memref<4x32xf32, #tpu.memory_space<vmem>>, vector<4x32xf32>
    %c0_21 = arith.constant 0 : index
    %c0_22 = arith.constant 0 : index
    %11 = vector.load %arg15[%c0_21, %c0_22] : memref<4x32xf32, #tpu.memory_space<vmem>>, vector<4x32xf32>
    %c0_23 = arith.constant 0 : index
    %c0_24 = arith.constant 0 : index
    %c0_25 = arith.constant 0 : index
    %12 = vector.load %arg16[%c0_23, %c0_24, %c0_25] : memref<3x32x32xbf16, #tpu.memory_space<vmem>>, vector<3x32x32xbf16>
    %c0_26 = arith.constant 0 : index
    %c0_27 = arith.constant 0 : index
    %13 = vector.load %arg17[%c0_26, %c0_27] : memref<1x32xf32, #tpu.memory_space<vmem>>, vector<1x32xf32>
    %c0_28 = arith.constant 0 : index
    %c0_29 = arith.constant 0 : index
    %c0_30 = arith.constant 0 : index
    %14 = vector.load %arg1[%c0_28, %c0_29, %c0_30] : memref<1x8x32xf32, #tpu.memory_space<vmem>>, vector<1x8x32xf32>
    %15 = vector.shape_cast %14 : vector<1x8x32xf32> to vector<8x32xf32>
    %c0_31 = arith.constant 0 : index
    %c0_32 = arith.constant 0 : index
    %c0_33 = arith.constant 0 : index
    %16 = vector.load %arg2[%c0_31, %c0_32, %c0_33] : memref<1x8x32xf32, #tpu.memory_space<vmem>>, vector<1x8x32xf32>
    %17 = vector.shape_cast %16 : vector<1x8x32xf32> to vector<8x32xf32>
    %c0_34 = arith.constant 0 : index
    %c0_35 = arith.constant 0 : index
    %c0_36 = arith.constant 0 : index
    %18 = vector.load %arg3[%c0_34, %c0_35, %c0_36] : memref<1x1x8xf32, #tpu.memory_space<vmem>>, vector<1x1x8xf32>
    %19 = vector.shape_cast %18 : vector<1x1x8xf32> to vector<1x8xf32>
    %cst = arith.constant 1.000000e+00 : f32
    %20 = vector.broadcast %cst : f32 to vector<1x8xf32>
    %21 = arith.subf %19, %20 : vector<1x8xf32>
    %cst_37 = arith.constant 1.000000e+09 : f32
    %22 = vector.broadcast %cst_37 : f32 to vector<1x8xf32>
    %23 = arith.mulf %21, %22 : vector<1x8xf32>
    %24 = vector.extract_strided_slice %10 {offsets = [0, 0], sizes = [1, 32], strides = [1, 1]} : vector<4x32xf32> to vector<1x32xf32>
    %25 = vector.extract_strided_slice %11 {offsets = [0, 0], sizes = [1, 32], strides = [1, 1]} : vector<4x32xf32> to vector<1x32xf32>
    %cst_38 = arith.constant dense<0.000000e+00> : vector<8xf32>
    %26 = vector.multi_reduction <add>, %15, %cst_38 [1] : vector<8x32xf32> to vector<8xf32>
    %27 = vector.shape_cast %26 : vector<8xf32> to vector<8x1xf32>
    %cst_39 = arith.constant 3.200000e+01 : f32
    %28 = vector.broadcast %cst_39 : f32 to vector<8x1xf32>
    %29 = arith.divf %27, %28 : vector<8x1xf32>
    %30 = vector.broadcast %29 : vector<8x1xf32> to vector<8x32xf32>
    %31 = arith.subf %15, %30 : vector<8x32xf32>
    %32 = arith.mulf %31, %31 : vector<8x32xf32>
    %cst_40 = arith.constant dense<0.000000e+00> : vector<8xf32>
    %33 = vector.multi_reduction <add>, %32, %cst_40 [1] : vector<8x32xf32> to vector<8xf32>
    %34 = vector.shape_cast %33 : vector<8xf32> to vector<8x1xf32>
    %cst_41 = arith.constant 3.200000e+01 : f32
    %35 = vector.broadcast %cst_41 : f32 to vector<8x1xf32>
    %36 = arith.divf %34, %35 : vector<8x1xf32>
    %37 = vector.broadcast %29 : vector<8x1xf32> to vector<8x32xf32>
    %38 = arith.subf %15, %37 : vector<8x32xf32>
    %cst_42 = arith.constant 9.99999997E-7 : f32
    %39 = vector.broadcast %cst_42 : f32 to vector<8x1xf32>
    %40 = arith.addf %36, %39 : vector<8x1xf32>
    %41 = math.rsqrt %40 : vector<8x1xf32>
    %42 = vector.broadcast %41 : vector<8x1xf32> to vector<8x32xf32>
    %43 = arith.mulf %38, %42 : vector<8x32xf32>
    %44 = vector.broadcast %24 : vector<1x32xf32> to vector<8x32xf32>
    %45 = arith.mulf %43, %44 : vector<8x32xf32>
    %46 = vector.broadcast %25 : vector<1x32xf32> to vector<8x32xf32>
    %47 = arith.addf %45, %46 : vector<8x32xf32>
    %48 = arith.truncf %47 : vector<8x32xf32> to vector<8x32xbf16>
    %cst_43 = arith.constant dense<0.000000e+00> : vector<8x96xf32>
    %49 = tpu.matmul %48, %0, %cst_43 {dimension_numbers = #tpu.dot_dimension_numbers<[1], [0], [0], [1], [0, 0, 1, 1], [], []>} : vector<8x32xbf16>, vector<32x96xbf16>, vector<8x96xf32> -> vector<8x96xf32>
    %50 = vector.broadcast %1 : vector<1x96xf32> to vector<8x96xf32>
    %51 = arith.addf %49, %50 : vector<8x96xf32>
    %52 = vector.extract_strided_slice %51 {offsets = [0, 0], sizes = [8, 32], strides = [1, 1]} : vector<8x96xf32> to vector<8x32xf32>
    %53 = vector.shape_cast %52 : vector<8x32xf32> to vector<8x4x8xf32>
    %54 = tpu.transpose %53, [1, 0, 2] : vector<8x4x8xf32> -> vector<4x8x8xf32>
    %55 = vector.extract_strided_slice %51 {offsets = [0, 32], sizes = [8, 32], strides = [1, 1]} : vector<8x96xf32> to vector<8x32xf32>
    %56 = vector.shape_cast %55 : vector<8x32xf32> to vector<8x4x8xf32>
    %57 = tpu.transpose %56, [1, 0, 2] : vector<8x4x8xf32> -> vector<4x8x8xf32>
    %58 = vector.extract_strided_slice %51 {offsets = [0, 64], sizes = [8, 32], strides = [1, 1]} : vector<8x96xf32> to vector<8x32xf32>
    %59 = vector.shape_cast %58 : vector<8x32xf32> to vector<8x4x8xf32>
    %60 = tpu.transpose %59, [1, 0, 2] : vector<8x4x8xf32> -> vector<4x8x8xf32>
    %61 = arith.truncf %60 : vector<4x8x8xf32> to vector<4x8x8xbf16>
    %62 = arith.truncf %54 : vector<4x8x8xf32> to vector<4x8x8xbf16>
    %63 = arith.truncf %57 : vector<4x8x8xf32> to vector<4x8x8xbf16>
    "tpu.trace_start"() <{level = 10 : i32, message = "hsk,htk->hst"}> : () -> ()
    %cst_44 = arith.constant dense<0.000000e+00> : vector<4x8x8xf32>
    %64 = tpu.matmul %62, %63, %cst_44 {dimension_numbers = #tpu.dot_dimension_numbers<[2], [2], [1], [1], [0, 0, 0, 1, 1, 1], [0], [0]>} : vector<4x8x8xbf16>, vector<4x8x8xbf16>, vector<4x8x8xf32> -> vector<4x8x8xf32>
    "tpu.trace_stop"() : () -> ()
    %cst_45 = arith.constant 0.353553385 : f32
    %65 = vector.broadcast %cst_45 : f32 to vector<4x8x8xf32>
    %66 = arith.mulf %64, %65 : vector<4x8x8xf32>
    %67 = vector.shape_cast %23 : vector<1x8xf32> to vector<1x1x8xf32>
    %68 = vector.broadcast %67 : vector<1x1x8xf32> to vector<4x8x8xf32>
    %69 = arith.addf %66, %68 : vector<4x8x8xf32>
    %cst_46 = arith.constant dense<0xFF800000> : vector<4x8xf32>
    %70 = vector.multi_reduction <maximumf>, %69, %cst_46 [2] : vector<4x8x8xf32> to vector<4x8xf32>
    %71 = vector.shape_cast %70 : vector<4x8xf32> to vector<4x8x1xf32>
    %72 = vector.broadcast %71 : vector<4x8x1xf32> to vector<4x8x8xf32>
    %73 = arith.subf %69, %72 : vector<4x8x8xf32>
    %74 = math.exp %73 : vector<4x8x8xf32>
    %cst_47 = arith.constant dense<0.000000e+00> : vector<4x8xf32>
    %75 = vector.multi_reduction <add>, %74, %cst_47 [2] : vector<4x8x8xf32> to vector<4x8xf32>
    %76 = vector.shape_cast %75 : vector<4x8xf32> to vector<4x8x1xf32>
    %77 = vector.broadcast %76 : vector<4x8x1xf32> to vector<4x8x8xf32>
    %78 = arith.divf %74, %77 : vector<4x8x8xf32>
    %79 = arith.truncf %78 : vector<4x8x8xf32> to vector<4x8x8xbf16>
    "tpu.trace_start"() <{level = 10 : i32, message = "hst,htk->hsk"}> : () -> ()
    %cst_48 = arith.constant dense<0.000000e+00> : vector<4x8x8xf32>
    %80 = tpu.matmul %79, %61, %cst_48 {dimension_numbers = #tpu.dot_dimension_numbers<[2], [1], [1], [2], [0, 0, 0, 1, 1, 2], [0], [0]>} : vector<4x8x8xbf16>, vector<4x8x8xbf16>, vector<4x8x8xf32> -> vector<4x8x8xf32>
    "tpu.trace_stop"() : () -> ()
    %81 = tpu.transpose %80, [1, 0, 2] : vector<4x8x8xf32> -> vector<8x4x8xf32>
    %82 = vector.shape_cast %81 : vector<8x4x8xf32> to vector<8x32xf32>
    %83 = arith.truncf %82 : vector<8x32xf32> to vector<8x32xbf16>
    %cst_49 = arith.constant dense<0.000000e+00> : vector<8x32xf32>
    %84 = tpu.matmul %83, %2, %cst_49 {dimension_numbers = #tpu.dot_dimension_numbers<[1], [0], [0], [1], [0, 0, 1, 1], [], []>} : vector<8x32xbf16>, vector<32x32xbf16>, vector<8x32xf32> -> vector<8x32xf32>
    %85 = vector.broadcast %3 : vector<1x32xf32> to vector<8x32xf32>
    %86 = arith.addf %84, %85 : vector<8x32xf32>
    %87 = arith.addf %15, %86 : vector<8x32xf32>
    %88 = vector.extract_strided_slice %10 {offsets = [1, 0], sizes = [1, 32], strides = [1, 1]} : vector<4x32xf32> to vector<1x32xf32>
    %89 = vector.extract_strided_slice %11 {offsets = [1, 0], sizes = [1, 32], strides = [1, 1]} : vector<4x32xf32> to vector<1x32xf32>
    %cst_50 = arith.constant dense<0.000000e+00> : vector<8xf32>
    %90 = vector.multi_reduction <add>, %87, %cst_50 [1] : vector<8x32xf32> to vector<8xf32>
    %91 = vector.shape_cast %90 : vector<8xf32> to vector<8x1xf32>
    %cst_51 = arith.constant 3.200000e+01 : f32
    %92 = vector.broadcast %cst_51 : f32 to vector<8x1xf32>
    %93 = arith.divf %91, %92 : vector<8x1xf32>
    %94 = vector.broadcast %93 : vector<8x1xf32> to vector<8x32xf32>
    %95 = arith.subf %87, %94 : vector<8x32xf32>
    %96 = arith.mulf %95, %95 : vector<8x32xf32>
    %cst_52 = arith.constant dense<0.000000e+00> : vector<8xf32>
    %97 = vector.multi_reduction <add>, %96, %cst_52 [1] : vector<8x32xf32> to vector<8xf32>
    %98 = vector.shape_cast %97 : vector<8xf32> to vector<8x1xf32>
    %cst_53 = arith.constant 3.200000e+01 : f32
    %99 = vector.broadcast %cst_53 : f32 to vector<8x1xf32>
    %100 = arith.divf %98, %99 : vector<8x1xf32>
    %101 = vector.broadcast %93 : vector<8x1xf32> to vector<8x32xf32>
    %102 = arith.subf %87, %101 : vector<8x32xf32>
    %cst_54 = arith.constant 9.99999997E-7 : f32
    %103 = vector.broadcast %cst_54 : f32 to vector<8x1xf32>
    %104 = arith.addf %100, %103 : vector<8x1xf32>
    %105 = math.rsqrt %104 : vector<8x1xf32>
    %106 = vector.broadcast %105 : vector<8x1xf32> to vector<8x32xf32>
    %107 = arith.mulf %102, %106 : vector<8x32xf32>
    %108 = vector.broadcast %88 : vector<1x32xf32> to vector<8x32xf32>
    %109 = arith.mulf %107, %108 : vector<8x32xf32>
    %110 = vector.broadcast %89 : vector<1x32xf32> to vector<8x32xf32>
    %111 = arith.addf %109, %110 : vector<8x32xf32>
    %112 = arith.truncf %111 : vector<8x32xf32> to vector<8x32xbf16>
    %cst_55 = arith.constant dense<0.000000e+00> : vector<8x64xf32>
    %113 = tpu.matmul %112, %4, %cst_55 {dimension_numbers = #tpu.dot_dimension_numbers<[1], [0], [0], [1], [0, 0, 1, 1], [], []>} : vector<8x32xbf16>, vector<32x64xbf16>, vector<8x64xf32> -> vector<8x64xf32>
    %114 = vector.broadcast %5 : vector<1x64xf32> to vector<8x64xf32>
    %115 = arith.addf %113, %114 : vector<8x64xf32>
    %116 = arith.truncf %17 : vector<8x32xf32> to vector<8x32xbf16>
    %cst_56 = arith.constant dense<0.000000e+00> : vector<8x32xf32>
    %117 = tpu.matmul %116, %6, %cst_56 {dimension_numbers = #tpu.dot_dimension_numbers<[1], [0], [0], [1], [0, 0, 1, 1], [], []>} : vector<8x32xbf16>, vector<32x32xbf16>, vector<8x32xf32> -> vector<8x32xf32>
    %118 = vector.broadcast %7 : vector<1x32xf32> to vector<8x32xf32>
    %119 = arith.addf %117, %118 : vector<8x32xf32>
    %120 = vector.extract_strided_slice %115 {offsets = [0, 0], sizes = [8, 32], strides = [1, 1]} : vector<8x64xf32> to vector<8x32xf32>
    %121 = vector.shape_cast %120 : vector<8x32xf32> to vector<8x4x8xf32>
    %122 = vector.extract_strided_slice %115 {offsets = [0, 32], sizes = [8, 32], strides = [1, 1]} : vector<8x64xf32> to vector<8x32xf32>
    %123 = vector.shape_cast %122 : vector<8x32xf32> to vector<8x4x8xf32>
    %124 = vector.shape_cast %119 : vector<8x32xf32> to vector<8x4x8xf32>
    %125 = arith.mulf %121, %123 : vector<8x4x8xf32>
    %cst_57 = arith.constant dense<0.000000e+00> : vector<8x4xf32>
    %126 = vector.multi_reduction <add>, %125, %cst_57 [2] : vector<8x4x8xf32> to vector<8x4xf32>
    %127 = vector.shape_cast %126 : vector<8x4xf32> to vector<8x4x1xf32>
    %cst_58 = arith.constant 0.353553385 : f32
    %128 = vector.broadcast %cst_58 : f32 to vector<8x4x1xf32>
    %129 = arith.mulf %127, %128 : vector<8x4x1xf32>
    %130 = arith.mulf %121, %124 : vector<8x4x8xf32>
    %cst_59 = arith.constant dense<0.000000e+00> : vector<8x4xf32>
    %131 = vector.multi_reduction <add>, %130, %cst_59 [2] : vector<8x4x8xf32> to vector<8x4xf32>
    %132 = vector.shape_cast %131 : vector<8x4xf32> to vector<8x4x1xf32>
    %cst_60 = arith.constant 0.353553385 : f32
    %133 = vector.broadcast %cst_60 : f32 to vector<8x4x1xf32>
    %134 = arith.mulf %132, %133 : vector<8x4x1xf32>
    %135 = arith.maximumf %129, %134 : vector<8x4x1xf32>
    %136 = arith.subf %129, %135 : vector<8x4x1xf32>
    %137 = math.exp %136 : vector<8x4x1xf32>
    %138 = arith.subf %134, %135 : vector<8x4x1xf32>
    %139 = math.exp %138 : vector<8x4x1xf32>
    %140 = vector.broadcast %137 : vector<8x4x1xf32> to vector<8x4x8xf32>
    %141 = arith.mulf %140, %123 : vector<8x4x8xf32>
    %142 = vector.broadcast %139 : vector<8x4x1xf32> to vector<8x4x8xf32>
    %143 = arith.mulf %142, %124 : vector<8x4x8xf32>
    %144 = arith.addf %141, %143 : vector<8x4x8xf32>
    %145 = arith.addf %137, %139 : vector<8x4x1xf32>
    %146 = vector.broadcast %145 : vector<8x4x1xf32> to vector<8x4x8xf32>
    %147 = arith.divf %144, %146 : vector<8x4x8xf32>
    %148 = vector.shape_cast %147 : vector<8x4x8xf32> to vector<8x32xf32>
    %149 = arith.truncf %148 : vector<8x32xf32> to vector<8x32xbf16>
    %cst_61 = arith.constant dense<0.000000e+00> : vector<8x32xf32>
    %150 = tpu.matmul %149, %8, %cst_61 {dimension_numbers = #tpu.dot_dimension_numbers<[1], [0], [0], [1], [0, 0, 1, 1], [], []>} : vector<8x32xbf16>, vector<32x32xbf16>, vector<8x32xf32> -> vector<8x32xf32>
    %151 = vector.broadcast %9 : vector<1x32xf32> to vector<8x32xf32>
    %152 = arith.addf %150, %151 : vector<8x32xf32>
    %153 = arith.addf %87, %152 : vector<8x32xf32>
    %154 = vector.extract_strided_slice %10 {offsets = [2, 0], sizes = [1, 32], strides = [1, 1]} : vector<4x32xf32> to vector<1x32xf32>
    %155 = vector.extract_strided_slice %11 {offsets = [2, 0], sizes = [1, 32], strides = [1, 1]} : vector<4x32xf32> to vector<1x32xf32>
    %cst_62 = arith.constant dense<0.000000e+00> : vector<8xf32>
    %156 = vector.multi_reduction <add>, %153, %cst_62 [1] : vector<8x32xf32> to vector<8xf32>
    %157 = vector.shape_cast %156 : vector<8xf32> to vector<8x1xf32>
    %cst_63 = arith.constant 3.200000e+01 : f32
    %158 = vector.broadcast %cst_63 : f32 to vector<8x1xf32>
    %159 = arith.divf %157, %158 : vector<8x1xf32>
    %160 = vector.broadcast %159 : vector<8x1xf32> to vector<8x32xf32>
    %161 = arith.subf %153, %160 : vector<8x32xf32>
    %162 = arith.mulf %161, %161 : vector<8x32xf32>
    %cst_64 = arith.constant dense<0.000000e+00> : vector<8xf32>
    %163 = vector.multi_reduction <add>, %162, %cst_64 [1] : vector<8x32xf32> to vector<8xf32>
    %164 = vector.shape_cast %163 : vector<8xf32> to vector<8x1xf32>
    %cst_65 = arith.constant 3.200000e+01 : f32
    %165 = vector.broadcast %cst_65 : f32 to vector<8x1xf32>
    %166 = arith.divf %164, %165 : vector<8x1xf32>
    %167 = vector.broadcast %159 : vector<8x1xf32> to vector<8x32xf32>
    %168 = arith.subf %153, %167 : vector<8x32xf32>
    %cst_66 = arith.constant 9.99999997E-7 : f32
    %169 = vector.broadcast %cst_66 : f32 to vector<8x1xf32>
    %170 = arith.addf %166, %169 : vector<8x1xf32>
    %171 = math.rsqrt %170 : vector<8x1xf32>
    %172 = vector.broadcast %171 : vector<8x1xf32> to vector<8x32xf32>
    %173 = arith.mulf %168, %172 : vector<8x32xf32>
    %174 = vector.broadcast %154 : vector<1x32xf32> to vector<8x32xf32>
    %175 = arith.mulf %173, %174 : vector<8x32xf32>
    %176 = vector.broadcast %155 : vector<1x32xf32> to vector<8x32xf32>
    %177 = arith.addf %175, %176 : vector<8x32xf32>
    %178 = tpu.iota {dimensions = array<i32: 0>} : vector<8x8xi32>
    %179 = tpu.iota {dimensions = array<i32: 1>} : vector<8x8xi32>
    %180 = vector.shape_cast %19 : vector<1x8xf32> to vector<1x8xf32>
    %181 = vector.broadcast %180 : vector<1x8xf32> to vector<8x8xf32>
    %c1_i32 = arith.constant 1 : i32
    %182 = vector.broadcast %c1_i32 : i32 to vector<8x8xi32>
    %183 = arith.addi %179, %182 : vector<8x8xi32>
    %184 = arith.cmpi eq, %178, %183 : vector<8x8xi32>
    %cst_67 = arith.constant 0.000000e+00 : f32
    %185 = vector.broadcast %cst_67 : f32 to vector<8x8xf32>
    %186 = arith.select %184, %181, %185 : vector<8x8xi1>, vector<8x8xf32>
    %187 = arith.cmpi eq, %178, %179 : vector<8x8xi32>
    %cst_68 = arith.constant 0.000000e+00 : f32
    %188 = vector.broadcast %cst_68 : f32 to vector<8x8xf32>
    %189 = arith.select %187, %181, %188 : vector<8x8xi1>, vector<8x8xf32>
    %c1_i32_69 = arith.constant 1 : i32
    %190 = vector.broadcast %c1_i32_69 : i32 to vector<8x8xi32>
    %191 = arith.subi %179, %190 : vector<8x8xi32>
    %192 = arith.cmpi eq, %178, %191 : vector<8x8xi32>
    %cst_70 = arith.constant 0.000000e+00 : f32
    %193 = vector.broadcast %cst_70 : f32 to vector<8x8xf32>
    %194 = arith.select %192, %181, %193 : vector<8x8xi1>, vector<8x8xf32>
    %cst_71 = arith.constant dense<0.000000e+00> : vector<8x32xf32>
    %195 = tpu.matmul %186, %177, %cst_71 {dimension_numbers = #tpu.dot_dimension_numbers<[1], [0], [0], [1], [0, 0, 1, 1], [], []>} : vector<8x8xf32>, vector<8x32xf32>, vector<8x32xf32> -> vector<8x32xf32>
    %cst_72 = arith.constant dense<0.000000e+00> : vector<8x32xf32>
    %196 = tpu.matmul %189, %177, %cst_72 {dimension_numbers = #tpu.dot_dimension_numbers<[1], [0], [0], [1], [0, 0, 1, 1], [], []>} : vector<8x8xf32>, vector<8x32xf32>, vector<8x32xf32> -> vector<8x32xf32>
    %cst_73 = arith.constant dense<0.000000e+00> : vector<8x32xf32>
    %197 = tpu.matmul %194, %177, %cst_73 {dimension_numbers = #tpu.dot_dimension_numbers<[1], [0], [0], [1], [0, 0, 1, 1], [], []>} : vector<8x8xf32>, vector<8x32xf32>, vector<8x32xf32> -> vector<8x32xf32>
    %198 = arith.truncf %195 : vector<8x32xf32> to vector<8x32xbf16>
    %199 = vector.extract_strided_slice %12 {offsets = [0, 0, 0], sizes = [1, 32, 32], strides = [1, 1, 1]} : vector<3x32x32xbf16> to vector<1x32x32xbf16>
    %200 = vector.shape_cast %199 : vector<1x32x32xbf16> to vector<32x32xbf16>
    %cst_74 = arith.constant dense<0.000000e+00> : vector<8x32xf32>
    %201 = tpu.matmul %198, %200, %cst_74 {dimension_numbers = #tpu.dot_dimension_numbers<[1], [0], [0], [1], [0, 0, 1, 1], [], []>} : vector<8x32xbf16>, vector<32x32xbf16>, vector<8x32xf32> -> vector<8x32xf32>
    %202 = arith.truncf %196 : vector<8x32xf32> to vector<8x32xbf16>
    %203 = vector.extract_strided_slice %12 {offsets = [1, 0, 0], sizes = [1, 32, 32], strides = [1, 1, 1]} : vector<3x32x32xbf16> to vector<1x32x32xbf16>
    %204 = vector.shape_cast %203 : vector<1x32x32xbf16> to vector<32x32xbf16>
    %cst_75 = arith.constant dense<0.000000e+00> : vector<8x32xf32>
    %205 = tpu.matmul %202, %204, %cst_75 {dimension_numbers = #tpu.dot_dimension_numbers<[1], [0], [0], [1], [0, 0, 1, 1], [], []>} : vector<8x32xbf16>, vector<32x32xbf16>, vector<8x32xf32> -> vector<8x32xf32>
    %206 = arith.addf %201, %205 : vector<8x32xf32>
    %207 = arith.truncf %197 : vector<8x32xf32> to vector<8x32xbf16>
    %208 = vector.extract_strided_slice %12 {offsets = [2, 0, 0], sizes = [1, 32, 32], strides = [1, 1, 1]} : vector<3x32x32xbf16> to vector<1x32x32xbf16>
    %209 = vector.shape_cast %208 : vector<1x32x32xbf16> to vector<32x32xbf16>
    %cst_76 = arith.constant dense<0.000000e+00> : vector<8x32xf32>
    %210 = tpu.matmul %207, %209, %cst_76 {dimension_numbers = #tpu.dot_dimension_numbers<[1], [0], [0], [1], [0, 0, 1, 1], [], []>} : vector<8x32xbf16>, vector<32x32xbf16>, vector<8x32xf32> -> vector<8x32xf32>
    %211 = arith.addf %206, %210 : vector<8x32xf32>
    %212 = vector.broadcast %13 : vector<1x32xf32> to vector<8x32xf32>
    %213 = arith.addf %211, %212 : vector<8x32xf32>
    %214 = arith.addf %153, %213 : vector<8x32xf32>
    %c0_77 = arith.constant 0 : index
    %c0_78 = arith.constant 0 : index
    %c0_79 = arith.constant 0 : index
    %215 = vector.load %arg18[%c0_77, %c0_78, %c0_79] : memref<1x8x32xf32, #tpu.memory_space<vmem>>, vector<1x8x32xf32>
    %216 = vector.shape_cast %215 : vector<1x8x32xf32> to vector<8x32xf32>
    %217 = vector.shape_cast %214 : vector<8x32xf32> to vector<1x8x32xf32>
    tpu.vector_store %arg18[%c0_77, %c0_78, %c0_79], %217 {strides = array<i32>} : memref<1x8x32xf32, #tpu.memory_space<vmem>>, vector<1x8x32xf32>,
    return
  }
  func.func @transform_0(%arg0: i32) -> (i32, i32, i32) {
    %c0_i32 = arith.constant 0 : i32
    %c0_i32_0 = arith.constant 0 : i32
    %c0_i32_1 = arith.constant 0 : i32
    return %arg0, %c0_i32, %c0_i32_0 : i32, i32, i32
  }
  func.func @transform_1(%arg0: i32) -> (i32, i32, i32) {
    %c0_i32 = arith.constant 0 : i32
    %c0_i32_0 = arith.constant 0 : i32
    %c0_i32_1 = arith.constant 0 : i32
    return %arg0, %c0_i32, %c0_i32_0 : i32, i32, i32
  }
  func.func @transform_2(%arg0: i32) -> (i32, i32, i32) {
    %c0_i32 = arith.constant 0 : i32
    %c0_i32_0 = arith.constant 0 : i32
    %c0_i32_1 = arith.constant 0 : i32
    return %arg0, %c0_i32, %c0_i32_0 : i32, i32, i32
  }
  func.func @transform_3(%arg0: i32) -> (i32, i32) {
    %c0_i32 = arith.constant 0 : i32
    %c0_i32_0 = arith.constant 0 : i32
    %c0_i32_1 = arith.constant 0 : i32
    return %c0_i32, %c0_i32_0 : i32, i32
  }
  func.func @transform_4(%arg0: i32) -> (i32, i32) {
    %c0_i32 = arith.constant 0 : i32
    %c0_i32_0 = arith.constant 0 : i32
    %c0_i32_1 = arith.constant 0 : i32
    return %c0_i32, %c0_i32_0 : i32, i32
  }
  func.func @transform_5(%arg0: i32) -> (i32, i32) {
    %c0_i32 = arith.constant 0 : i32
    %c0_i32_0 = arith.constant 0 : i32
    %c0_i32_1 = arith.constant 0 : i32
    return %c0_i32, %c0_i32_0 : i32, i32
  }
  func.func @transform_6(%arg0: i32) -> (i32, i32) {
    %c0_i32 = arith.constant 0 : i32
    %c0_i32_0 = arith.constant 0 : i32
    %c0_i32_1 = arith.constant 0 : i32
    return %c0_i32, %c0_i32_0 : i32, i32
  }
  func.func @transform_7(%arg0: i32) -> (i32, i32) {
    %c0_i32 = arith.constant 0 : i32
    %c0_i32_0 = arith.constant 0 : i32
    %c0_i32_1 = arith.constant 0 : i32
    return %c0_i32, %c0_i32_0 : i32, i32
  }
  func.func @transform_8(%arg0: i32) -> (i32, i32) {
    %c0_i32 = arith.constant 0 : i32
    %c0_i32_0 = arith.constant 0 : i32
    %c0_i32_1 = arith.constant 0 : i32
    return %c0_i32, %c0_i32_0 : i32, i32
  }
  func.func @transform_9(%arg0: i32) -> (i32, i32) {
    %c0_i32 = arith.constant 0 : i32
    %c0_i32_0 = arith.constant 0 : i32
    %c0_i32_1 = arith.constant 0 : i32
    return %c0_i32, %c0_i32_0 : i32, i32
  }
  func.func @transform_10(%arg0: i32) -> (i32, i32) {
    %c0_i32 = arith.constant 0 : i32
    %c0_i32_0 = arith.constant 0 : i32
    %c0_i32_1 = arith.constant 0 : i32
    return %c0_i32, %c0_i32_0 : i32, i32
  }
  func.func @transform_11(%arg0: i32) -> (i32, i32) {
    %c0_i32 = arith.constant 0 : i32
    %c0_i32_0 = arith.constant 0 : i32
    %c0_i32_1 = arith.constant 0 : i32
    return %c0_i32, %c0_i32_0 : i32, i32
  }
  func.func @transform_12(%arg0: i32) -> (i32, i32) {
    %c0_i32 = arith.constant 0 : i32
    %c0_i32_0 = arith.constant 0 : i32
    %c0_i32_1 = arith.constant 0 : i32
    return %c0_i32, %c0_i32_0 : i32, i32
  }
  func.func @transform_13(%arg0: i32) -> (i32, i32) {
    %c0_i32 = arith.constant 0 : i32
    %c0_i32_0 = arith.constant 0 : i32
    %c0_i32_1 = arith.constant 0 : i32
    return %c0_i32, %c0_i32_0 : i32, i32
  }
  func.func @transform_14(%arg0: i32) -> (i32, i32) {
    %c0_i32 = arith.constant 0 : i32
    %c0_i32_0 = arith.constant 0 : i32
    %c0_i32_1 = arith.constant 0 : i32
    return %c0_i32, %c0_i32_0 : i32, i32
  }
  func.func @transform_15(%arg0: i32) -> (i32, i32, i32) {
    %c0_i32 = arith.constant 0 : i32
    %c0_i32_0 = arith.constant 0 : i32
    %c0_i32_1 = arith.constant 0 : i32
    %c0_i32_2 = arith.constant 0 : i32
    return %c0_i32, %c0_i32_0, %c0_i32_1 : i32, i32, i32
  }
  func.func @transform_16(%arg0: i32) -> (i32, i32) {
    %c0_i32 = arith.constant 0 : i32
    %c0_i32_0 = arith.constant 0 : i32
    %c0_i32_1 = arith.constant 0 : i32
    return %c0_i32, %c0_i32_0 : i32, i32
  }
  func.func @transform_17(%arg0: i32) -> (i32, i32, i32) {
    %c0_i32 = arith.constant 0 : i32
    %c0_i32_0 = arith.constant 0 : i32
    %c0_i32_1 = arith.constant 0 : i32
    return %arg0, %c0_i32, %c0_i32_0 : i32, i32, i32
  }
}

</mosaic_0001>

<bundles_post_ra>
// kernel: tpu_custom_call.1
= control target key start
LH: loop header
LB: loop body
LE: loop exit
PB: predicated region body
PF: predicated region fallthrough
CT: control target
= control target key end

     0   :  { %s5429_s0 = inlined_call_operand.hbm [shape: f32[2,8,32], index: 0, kind: input, shape index: {}]   ;;  %s5430_s1 = inlined_call_operand.hbm [shape: f32[2,8,32], index: 1, kind: input, shape index: {}]   ;;  %s5431_s2 = inlined_call_operand.hbm [shape: f32[2,1,8], index: 2, kind: input, shape index: {}]   ;;  %s5432_s3 = inlined_call_operand.hbm [shape: bf16[32,96], index: 3, kind: input, shape index: {}]   ;;  %s5433_s4 = inlined_call_operand.hbm [shape: f32[1,96], index: 4, kind: input, shape index: {}]   ;;  %s5434_s5 = inlined_call_operand.hbm [shape: bf16[32,32], index: 5, kind: input, shape index: {}]   ;;  %s5435_s6 = inlined_call_operand.hbm [shape: f32[1,32], index: 6, kind: input, shape index: {}]   ;;  %s5436_s7 = inlined_call_operand.hbm [shape: bf16[32,64], index: 7, kind: input, shape index: {}]   ;;  %s5437_s8 = inlined_call_operand.hbm [shape: f32[1,64], index: 8, kind: input, shape index: {}]   ;;  %s5438_s9 = inlined_call_operand.hbm [shape: bf16[32,32], index: 9, kind: input, shape index: {}]   ;;  %s5439_s10 = inlined_call_operand.hbm [shape: f32[1,32], index: 10, kind: input, shape index: {}]   ;;  %s5440_s11 = inlined_call_operand.hbm [shape: bf16[32,32], index: 11, kind: input, shape index: {}]   ;;  %s5441_s12 = inlined_call_operand.hbm [shape: f32[1,32], index: 12, kind: input, shape index: {}]   ;;  %s5442_s13 = inlined_call_operand.vmem [shape: f32[4,32], index: 13, kind: input, shape index: {}]   ;;  %s5443_s14 = inlined_call_operand.vmem [shape: f32[4,32], index: 14, kind: input, shape index: {}]   ;;  %s5444_s15 = inlined_call_operand.vmem [shape: bf16[3,32,32], index: 15, kind: input, shape index: {}]   ;;  %s5445_s16 = inlined_call_operand.vmem [shape: f32[1,32], index: 16, kind: input, shape index: {}]   ;;  %s5446_s17 = inlined_call_operand.hbm [shape: f32[2,8,32], index: 17, kind: output, shape index: {}]  }
   0x1   :  { %5473 = sst [smem:[#allocation36_spill]] %s5429_s0 }
   0x2   :  { %5474 = sst [smem:[#allocation37_spill]] %s5430_s1 }
   0x3   :  { %5475 = sst [smem:[#allocation38_spill]] %s5431_s2 }
   0x4   :  { %5476 = sst [smem:[#allocation39_spill]] %s5432_s3 }
   0x5   :  { %5477 = sst [smem:[#allocation40_spill]] %s5433_s4 }
   0x6   :  { %5478 = sst [smem:[#allocation41_spill]] %s5434_s5 }
   0x7   :  { %5479 = sst [smem:[#allocation42_spill]] %s5435_s6 }
   0x8   :  { %5480 = sst [smem:[#allocation43_spill]] %s5436_s7 }
   0x9   :  { %5481 = sst [smem:[#allocation44_spill]] %s5438_s9 }
   0xa   :  { %5482 = sst [smem:[#allocation45_spill]] %s5440_s11 }
   0xb   :  { %5483 = sst [smem:[#allocation46_spill]] %s5442_s13 }
   0xc   :  { %5484 = sst [smem:[#allocation47_spill]] %s5443_s14 }
   0xd   :  { %5485 = sst [smem:[#allocation48_spill]] %s5444_s15 }
   0xe   :  { %5486 = sst [smem:[#allocation49_spill]] %s5445_s16 }
   0xf   :  { %5487 = sst [smem:[#allocation50_spill]] %s5446_s17 }
  0x10   :  { %22 = vsyncpa [#allocation3], 0 }
  0x11   :  { %24 = vsyncpa [#allocation3 + $0x1], 0 }
  0x12   :  { %25 = vsyncpa [#allocation6], 0 }
  0x13   :  { %27 = vsyncpa [#allocation6 + $0x1], 0 }
  0x14   :  { %28 = vsyncpa [#allocation9], 0 }
  0x15   :  { %29 = vsyncpa [#allocation12], 0 }
  0x16   :  { %30 = vsyncpa [#allocation15], 0 }
  0x17   :  { %31 = vsyncpa [#allocation18], 0 }
  0x18   :  { %32 = vsyncpa [#allocation21], 0 }
  0x19   :  { %33 = vsyncpa [#allocation4], 0 }
  0x1a   :  { %35 = vsyncpa [#allocation4 + $0x1], 0  ;;  %s4474_s24 = smov 0   ;;  %s4476_s25 = smov 0  }
  0x1b   :  { %s4478_s26 = smov 0   ;;  %s4480_s27 = smov 0  }
  0x1c LB: > { %5488 = sst [smem:[#allocation32_spill]] %s4350_s26  ;;  %s4356_s28 = smov [#allocation8]   ;;  %s4354_s27 = sphi %s4480_s27, %s5539_s27   ;;  %s4350_s26 = sphi %s4478_s26, %s5541_s26   ;;  %s4346_s25 = sphi %s4476_s25, %s5543_s25   ;;  %s4342_s24 = sphi %s4474_s24, %s5542_s24  }
  0x1d   : > { %s456_s29 = sshll.u32 %s4356_s28, 4  ;;  %s4495_s0 = sadd.s32 4294967295, %s4354_s27   ;;  %s4500_s29 = int_to_ptr.vmem [resolvable:$true] %s456_s29 }
  0x1e   : > { %p3374_p0 = scmp.ge.s32.totalorder %s4354_s27, 1  ;;  %p5455_p1 = scmp.eq.s32.totalorder %s4495_s0, 0 }
  0x1f   : > { %p444_p2 = scmp.lt.s32.totalorder %s4354_s27, 3  ;;  %s4357_s18 = smov [#allocation11]  }
  0x20   : > { %s480_s19 = sshll.u32 %s4357_s18, 4  ;;  %s4358_s20 = smov [#allocation14]   ;;  %s4515_s19 = int_to_ptr.vmem [resolvable:$true] %s480_s19 }
  0x21   : > { %p4502_p3 = pnand %p3374_p0, %p444_p2  ;;  %s504_s21 = sshll.u32 %s4358_s20, 4  ;;  %s4517_s21 = int_to_ptr.vmem [resolvable:$true] %s504_s21 }
  0x22   : > { %s5492_s3 = sld [smem:[#allocation39_spill]] }
  0x23   : > { %s5489_s30 = scalar_select %p4502_p3, 1, 0 }
  0x24   : > { %p3681_p5 = pneg %p4502_p3 }
  0x25   : > { %5490 = sst [smem:[#allocation33_spill]] %s5489_s30 }
  0x26   : > { %p4511_p6 = pnand %p3681_p5, %p5455_p1 }
  0x28   : > { %s5491_s1 = scalar_select %p4511_p6, 1, 0 }
  0x29   : > { %s3894_s28 = scalar_lea.hbm %s5492_s3, 256  ;;  %p4527_p8 = pneg %p4511_p6 }
  0x2a   : > { %p3895_p7 = scmp.ne.s32.totalorder %s5492_s3, %s3894_s28  ;;  %p3901_p11 = scmp.lt.u32.totalorder %s3894_s28, %s5492_s3 }
  0x2b   : > { %s5493_s18 = scalar_select %p4527_p8, 1, 0 }
  0x2c   : > { %p3897_p9 = pnand %p4527_p8, %p3895_p7 }
  0x2e   : > { %p3898_p10 = pneg %p3897_p9 }
  0x30   : > { %p3903_p12 = pnand %p3901_p11, %p3898_p10 }
  0x32   : > { %3906 = shalt.err (!%p3903_p12)
}
  0x33   : > { %s3907_s16 = scalar_lea.vmem %s4500_s29, 256  ;;  %p3915_p5 = scmp.lt.s32.totalorder %s4500_s29, %s4500_s29 }
  0x34   : > { %p3908_p13 = scmp.ne.s32.totalorder %s4500_s29, %s3907_s16  ;;  %p3916_p4 = scmp.lt.s32.totalorder %s3907_s16, %s3907_s16 }
  0x36   : > { %p3910_p0 = pnand %p3908_p13, %p4527_p8  ;;  %p3917_p7 = por %p3916_p4, %p3915_p5 }
  0x38   : > { %p3911_p2 = pneg %p3910_p0 }
  0x3a   : > { %p3918_p9 = pnand %p3917_p7, %p3911_p2 }
  0x3c   : > { %3921 = shalt.err (!%p3918_p9)
}
  0x3d   : > { %s4359_s17 = smov 64   ;;  %s4360_s15 = smov 4  }
  0x3e   : > { %3684 = dma.hbm_to_vmem [thread:$0]  (!%p4511_p6), %s5492_s3, 256, %s4500_s29, [#allocation9], %s4359_s17, %s4359_s17, %s4360_s15  }
  0x3f   : > { %s5494_s5 = sld [smem:[#allocation41_spill]] }
  0x45   : > { %s3922_s16 = scalar_lea.hbm %s5494_s5, 256 }
  0x46   : > { %p3923_p4 = scmp.ne.s32.totalorder %s5494_s5, %s3922_s16  ;;  %p3929_p12 = scmp.lt.u32.totalorder %s3922_s16, %s5494_s5 }
  0x48   : > { %p3925_p10 = pnand %p3923_p4, %p4527_p8 }
  0x4a   : > { %p3926_p11 = pneg %p3925_p10 }
  0x4c   : > { %p3931_p13 = pnand %p3929_p12, %p3926_p11 }
  0x4e   : > { %3934 = shalt.err (!%p3931_p13)
}
  0x4f   : > { %s3935_s29 = scalar_lea.vmem %s4515_s19, 256  ;;  %p3943_p7 = scmp.lt.s32.totalorder %s4515_s19, %s4515_s19 }
  0x50   : > { %p3936_p0 = scmp.ne.s32.totalorder %s4515_s19, %s3935_s29  ;;  %p3944_p9 = scmp.lt.s32.totalorder %s3935_s29, %s3935_s29 }
  0x52   : > { %p3938_p2 = pnand %p3936_p0, %p4527_p8  ;;  %p3945_p4 = por %p3944_p9, %p3943_p7 }
  0x54   : > { %p3939_p5 = pneg %p3938_p2 }
  0x56   : > { %p3946_p10 = pnand %p3945_p4, %p3939_p5 }
  0x58   : > { %3949 = shalt.err (!%p3946_p10)
}
  0x59   : > { %3690 = dma.hbm_to_vmem [thread:$0]  (!%p4511_p6), %s5494_s5, 256, %s4515_s19, [#allocation12], %s4359_s17, %s4359_s17, %s4360_s15  }
  0x5a   : > { %s5495_s7 = sld [smem:[#allocation43_spill]] }
  0x60   : > { %s3950_s22 = scalar_lea.hbm %s5495_s7, 256 }
  0x61   : > { %p3951_p11 = scmp.ne.s32.totalorder %s5495_s7, %s3950_s22  ;;  %p3957_p0 = scmp.lt.u32.totalorder %s3950_s22, %s5495_s7 }
  0x63   : > { %p3953_p12 = pnand %p3951_p11, %p4527_p8 }
  0x65   : > { %p3954_p13 = pneg %p3953_p12 }
  0x67   : > { %p3959_p2 = pnand %p3957_p0, %p3954_p13 }
  0x69   : > { %3962 = shalt.err (!%p3959_p2)
}
  0x6a   : > { %s3963_s19 = scalar_lea.vmem %s4517_s21, 256  ;;  %p3971_p4 = scmp.lt.s32.totalorder %s4517_s21, %s4517_s21 }
  0x6b   : > { %p3964_p5 = scmp.ne.s32.totalorder %s4517_s21, %s3963_s19  ;;  %p3972_p10 = scmp.lt.s32.totalorder %s3963_s19, %s3963_s19 }
  0x6d   : > { %p3966_p7 = pnand %p3964_p5, %p4527_p8  ;;  %p3973_p11 = por %p3972_p10, %p3971_p4 }
  0x6f   : > { %p3967_p9 = pneg %p3966_p7 }
  0x71   : > { %p3974_p12 = pnand %p3973_p11, %p3967_p9 }
  0x73   : > { %3977 = shalt.err (!%p3974_p12)
}
  0x74   : > { %3696 = dma.hbm_to_vmem [thread:$0]  (!%p4511_p6), %s5495_s7, 256, %s4517_s21, [#allocation15], %s4359_s17, %s4359_s17, %s4360_s15  }
  0x75   : > { %s4361_s13 = smov [#allocation17]   ;;  %s4362_s30 = smov [#allocation20]  }
  0x76   : > { %s528_s14 = sshll.u32 %s4361_s13, 4  ;;  %s552_s22 = sshll.u32 %s4362_s30, 4  ;;  %s529_s14 = int_to_ptr.vmem [resolvable:$true] %s528_s14  ;;  %s553_s22 = int_to_ptr.vmem [resolvable:$true] %s552_s22 }
  0x77   : > { %s5496_s9 = sld [smem:[#allocation44_spill]] }
  0x7d   : > { %s3978_s20 = scalar_lea.hbm %s5496_s9, 256 }
  0x7e   : > { %p3979_p13 = scmp.ne.s32.totalorder %s5496_s9, %s3978_s20  ;;  %p3985_p5 = scmp.lt.u32.totalorder %s3978_s20, %s5496_s9 }
  0x80   : > { %p3981_p0 = pnand %p3979_p13, %p4527_p8 }
  0x82   : > { %p3982_p2 = pneg %p3981_p0 }
  0x84   : > { %p3987_p7 = pnand %p3985_p5, %p3982_p2 }
  0x86   : > { %3990 = shalt.err (!%p3987_p7)
}
  0x87   : > { %s3991_s21 = scalar_lea.vmem %s529_s14, 256  ;;  %p3999_p11 = scmp.lt.s32.totalorder %s529_s14, %s529_s14 }
  0x88   : > { %p3992_p9 = scmp.ne.s32.totalorder %s529_s14, %s3991_s21  ;;  %p4000_p12 = scmp.lt.s32.totalorder %s3991_s21, %s3991_s21 }
  0x8a   : > { %p3994_p4 = pnand %p3992_p9, %p4527_p8  ;;  %p4001_p1 = por %p4000_p12, %p3999_p11 }
  0x8c   : > { %p3995_p10 = pneg %p3994_p4 }
  0x8e   : > { %p4002_p3 = pnand %p4001_p1, %p3995_p10 }
  0x90   : > { %4005 = shalt.err (!%p4002_p3)
}
  0x91   : > { %3702 = dma.hbm_to_vmem [thread:$0]  (!%p4511_p6), %s5496_s9, 256, %s529_s14, [#allocation18], %s4359_s17, %s4359_s17, %s4360_s15  }
  0x92   : > { %s5497_s11 = sld [smem:[#allocation45_spill]] }
  0x98   : > { %s4006_s23 = scalar_lea.hbm %s5497_s11, 256 }
  0x99   : > { %p4007_p1 = scmp.ne.s32.totalorder %s5497_s11, %s4006_s23  ;;  %p4013_p0 = scmp.lt.u32.totalorder %s4006_s23, %s5497_s11 }
  0x9b   : > { %p4009_p3 = pnand %p4007_p1, %p4527_p8 }
  0x9d   : > { %p4010_p13 = pneg %p4009_p3 }
  0x9f   : > { %p4015_p2 = pnand %p4013_p0, %p4010_p13 }
  0xa1   : > { %4018 = shalt.err (!%p4015_p2)
}
  0xa2   : > { %s4019_s29 = scalar_lea.vmem %s553_s22, 256  ;;  %p4027_p4 = scmp.lt.s32.totalorder %s553_s22, %s553_s22 }
  0xa3   : > { %p4020_p5 = scmp.ne.s32.totalorder %s553_s22, %s4019_s29  ;;  %p4028_p10 = scmp.lt.s32.totalorder %s4019_s29, %s4019_s29 }
  0xa5   : > { %p4022_p7 = pnand %p4020_p5, %p4527_p8  ;;  %p4029_p11 = por %p4028_p10, %p4027_p4 }
  0xa7   : > { %p4023_p9 = pneg %p4022_p7 }
  0xa9   : > { %p4030_p12 = pnand %p4029_p11, %p4023_p9 }
  0xab   : > { %4033 = shalt.err (!%p4030_p12)
}
  0xac   : > { %3708 = dma.hbm_to_vmem [thread:$0]  (!%p4511_p6), %s5497_s11, 256, %s553_s22, [#allocation21], %s4359_s17, %s4359_s17, %s4360_s15  }
  0xad   : > { %s3373_s3 = sadd.s32 4294967294, %s4354_s27   ;;  %s4647_s2 = sadd.s32 1, %s4354_s27  }
  0xae   : > { %5498 = sst [smem:[#allocation34_spill]] %s4647_s2  ;;  %s48_s13 = sadd.s32 1, %s4350_s26 }
  0xaf   : > { %s45_s30 = ssub.s32 %s4354_s27, %s4647_s2  ;;  %p55_p1 = scmp.ne.s32.totalorder %s4350_s26, %s4346_s25 }
  0xb0   : > { %p46_p3 = scmp.eq.s32.totalorder %s45_s30, 0  ;;  %p56_p13 = scmp.eq.s32.totalorder %s4354_s27, 0 }
  0xb1   : > { %p61_p0 = scmp.ne.s32.totalorder %s4346_s25, %s4342_s24  ;;  %p431_p2 = scmp.eq.s32.totalorder %s4495_s0, 1 }
  0xb2   : > { %s4659_s23 = scalar_select %p46_p3, %s4350_s26, %s48_s13  }
  0xb3   : > { %p57_p5 = por %p56_p13, %p55_p1  ;;  %p5500_p7 = scmp.eq.s32.totalorder %s4495_s0, 0 }
  0xb4   : > { %5499 = sst [smem:[#allocation35_spill]] %s4659_s23  ;;  %p4667_p4 = por %p431_p2, %p55_p1 }
  0xb5   : > { %p4663_p9 = por %p5500_p7, %p61_p0  ;;  %p437_p10 = scmp.eq.s32.totalorder %s3373_s3, 1 }
  0xb6   : > { %s5502_s15 = scalar_select %p4667_p4, 1, 0 }
  0xb7   : > { %s5501_s17 = scalar_select %p4663_p9, 1, 0 }
  0xb8   : > { %p3736_p11 = scmp.lt.s32.totalorder %s4354_s27, 2  ;;  %s4673_s22 = sand.u32 1, %s4350_s26  }
  0xb9   : > { %p4675_p12 = por %p437_p10, %p61_p0  ;;  %s5457_s20 = sshll.u32 %s4673_s22, 3 }
  0xba   : > { %s5458_s16 = sshll.u32 %s4354_s27, 7  ;;  %p4681_p3 = pnand %p3736_p11, %p57_p5 }
  0xbb   : > { %s5503_s28 = scalar_select %p4675_p12, 1, 0 }
  0xbc   : > { %s5504_s19 = scalar_select %p4681_p3, 1, 0 }
  0xbd   : > { %s607_s29 = sand.u32 1, %s4354_s27   ;;  %s5505_s3 = sld [smem:[#allocation37_spill]] }
  0xbe   : > { %s611_s30 = scalar_lea.vmem [#allocation5], %s5457_s20  ;;  %s4697_s7 = scalar_lea.sflag [#allocation6], %s607_s29 }
  0xbf   : > { %s618_s5 = sshll.u32 %s611_s30, 4  ;;  %p4703_p13 = pneg %p4681_p3  ;;  %s4695_s5 = int_to_ptr.vmem [resolvable:$true] %s618_s5 }
  0xc1   : > { %s5506_s11 = scalar_select %p4703_p13, 1, 0 }
  0xc3   : > { %s4691_s13 = scalar_lea.hbm %s5505_s3, %s5458_s16  ;;  %s4039_s20 = scalar_lea.hbm %s5505_s3, 256 }
  0xc4   : > { %s4034_s9 = scalar_lea.hbm %s4691_s13, 128  ;;  %p4040_p5 = scmp.lt.u32.totalorder %s4691_s13, %s5505_s3 }
  0xc5   : > { %p4035_p1 = scmp.ne.s32.totalorder %s4691_s13, %s4034_s9  ;;  %p4041_p7 = scmp.lt.u32.totalorder %s4039_s20, %s4034_s9 }
  0xc6   : > { %p4043_p11 = scmp.lt.u32.totalorder %s4034_s9, %s4691_s13 }
  0xc7   : > { %p4037_p0 = pnand %p4703_p13, %p4035_p1  ;;  %p4042_p10 = por %p4041_p7, %p4040_p5 }
  0xc9   : > { %p4038_p2 = pneg %p4037_p0  ;;  %p4044_p12 = por %p4043_p11, %p4042_p10 }
  0xcb   : > { %p4045_p4 = pnand %p4044_p12, %p4038_p2 }
  0xcd   : > { %4048 = shalt.err (!%p4045_p4)
}
  0xce   : > { %s4049_s29 = scalar_lea.vmem %s4695_s5, 128  ;;  %s4363_s14 = smov [#allocation5]  }
  0xcf   : > { %p4050_p1 = scmp.ne.s32.totalorder %s4695_s5, %s4049_s29  ;;  %s4054_s21 = sshll.u32 %s4363_s14, 4  ;;  %s4055_s21 = int_to_ptr.vmem [resolvable:$false] %s4054_s21 }
  0xd0   : > { %s4056_s16 = scalar_lea.vmem %s4055_s21, 256  ;;  %p4057_p6 = scmp.lt.s32.totalorder %s4695_s5, %s4055_s21 }
  0xd1   : > { %p4052_p0 = pnand %p4050_p1, %p4703_p13  ;;  %p4058_p8 = scmp.lt.s32.totalorder %s4056_s16, %s4049_s29 }
  0xd3   : > { %p4053_p9 = pneg %p4052_p0  ;;  %p4059_p5 = por %p4058_p8, %p4057_p6 }
  0xd5   : > { %p4060_p7 = pnand %p4059_p5, %p4053_p9 }
  0xd7   : > { %4063 = shalt.err (!%p4060_p7)
}
  0xd8   : > { %3718 = dma.hbm_to_vmem [thread:$0]  (!%p4681_p3), %s4691_s13, 128, %s4695_s5, %s4697_s7  }
  0xd9   : > { %s4364_s9 = smov [#allocation10]   ;;  %s4365_s30 = smov [#allocation13]  }
  0xda   : > { %s470_s20 = sshll.u32 %s4364_s9, 4  ;;  %s494_s3 = sshll.u32 %s4365_s30, 4  ;;  %s471_s20 = int_to_ptr.vmem [resolvable:$true] %s470_s20  ;;  %s495_s3 = int_to_ptr.vmem [resolvable:$true] %s494_s3 }
  0xdb   : > { %s5507_s4 = sld [smem:[#allocation40_spill]]  ;;  %p5508_p8 = scmp.ne.s32.totalorder %s5493_s18, 0 }
  0xe1   : > { %s4064_s21 = scalar_lea.hbm %s5507_s4, 16 }
  0xe2   : > { %p4065_p6 = scmp.ne.s32.totalorder %s5507_s4, %s4064_s21  ;;  %p4071_p12 = scmp.lt.u32.totalorder %s4064_s21, %s5507_s4 }
  0xe4   : > { %p4067_p9 = pnand %p4065_p6, %p5508_p8 }
  0xe6   : > { %p4068_p4 = pneg %p4067_p9 }
  0xe8   : > { %p4073_p2 = pnand %p4071_p12, %p4068_p4 }
  0xea   : > { %4076 = shalt.err (!%p4073_p2)
}
  0xeb   : > { %s4077_s5 = scalar_lea.vmem %s471_s20, 16  ;;  %s4084_s23 = scalar_lea.vmem %s471_s20, 32 }
  0xec   : > { %p4078_p10 = scmp.ne.s32.totalorder %s471_s20, %s4077_s5  ;;  %p4085_p0 = scmp.lt.s32.totalorder %s471_s20, %s471_s20 }
  0xed   : > { %p4086_p5 = scmp.lt.s32.totalorder %s4084_s23, %s4077_s5 }
  0xee   : > { %p4080_p11 = pnand %p4078_p10, %p5508_p8 }
  0xef   : > { %p4087_p7 = por %p4086_p5, %p4085_p0 }
  0xf0   : > { %p4081_p1 = pneg %p4080_p11 }
  0xf2   : > { %p4088_p3 = pnand %p4087_p7, %p4081_p1 }
  0xf4   : > { %4091 = shalt.err (!%p4088_p3)
}
  0xf5   : > { %p5509_p6 = scmp.ne.s32.totalorder %s5491_s1, 0  ;;  %s5510_s6 = sld [smem:[#allocation42_spill]] }
  0xf7   : > { %3687 = dma.hbm_to_vmem [thread:$0]  (!%p5509_p6), %s5507_s4, 16, %s471_s20, [#allocation9]  }
  0xfb   : > { %s4092_s30 = scalar_lea.hbm %s5510_s6, 16 }
  0xfc   : > { %p4093_p9 = scmp.ne.s32.totalorder %s5510_s6, %s4092_s30  ;;  %p4099_p3 = scmp.lt.u32.totalorder %s4092_s30, %s5510_s6 }
  0xfe   : > { %p4095_p4 = pnand %p4093_p9, %p5508_p8 }
 0x100   : > { %p4096_p12 = pneg %p4095_p4 }
 0x102   : > { %p4101_p2 = pnand %p4099_p3, %p4096_p12 }
 0x104   : > { %4104 = shalt.err (!%p4101_p2)
}
 0x105   : > { %s4105_s5 = scalar_lea.vmem %s495_s3, 16  ;;  %s4112_s20 = scalar_lea.vmem %s495_s3, 32 }
 0x106   : > { %p4106_p10 = scmp.ne.s32.totalorder %s495_s3, %s4105_s5  ;;  %p4113_p0 = scmp.lt.s32.totalorder %s495_s3, %s495_s3 }
 0x107   : > { %p4114_p5 = scmp.lt.s32.totalorder %s4112_s20, %s4105_s5 }
 0x108   : > { %p4108_p11 = pnand %p4106_p10, %p5508_p8 }
 0x109   : > { %p4115_p7 = por %p4114_p5, %p4113_p0 }
 0x10a   : > { %p4109_p1 = pneg %p4108_p11 }
 0x10c   : > { %p4116_p13 = pnand %p4115_p7, %p4109_p1 }
 0x10e   : > { %4119 = shalt.err (!%p4116_p13)
}
 0x10f   : > { %3693 = dma.hbm_to_vmem [thread:$0]  (!%p5509_p6), %s5510_s6, 16, %s495_s3, [#allocation12]  }
 0x110   : > { %s4366_s9 = smov [#allocation16]   ;;  %s4367_s2 = smov [#allocation19]  }
 0x111   : > { %s518_s26 = sshll.u32 %s4366_s9, 4  ;;  %s542_s30 = sshll.u32 %s4367_s2, 4  ;;  %s519_s26 = int_to_ptr.vmem [resolvable:$true] %s518_s26  ;;  %s543_s30 = int_to_ptr.vmem [resolvable:$true] %s542_s30 }
 0x112   : > { %s4120_s29 = scalar_lea.hbm %s5437_s8, 16 }
 0x113   : > { %p4121_p13 = scmp.ne.s32.totalorder %s5437_s8, %s4120_s29  ;;  %p4127_p12 = scmp.lt.u32.totalorder %s4120_s29, %s5437_s8 }
 0x115   : > { %p4123_p9 = pnand %p4121_p13, %p5508_p8 }
 0x117   : > { %p4124_p4 = pneg %p4123_p9 }
 0x119   : > { %p4129_p3 = pnand %p4127_p12, %p4124_p4 }
 0x11b   : > { %4132 = shalt.err (!%p4129_p3)
}
 0x11c   : > { %s4133_s3 = scalar_lea.vmem %s519_s26, 16  ;;  %s4140_s13 = scalar_lea.vmem %s519_s26, 32 }
 0x11d   : > { %p4134_p2 = scmp.ne.s32.totalorder %s519_s26, %s4133_s3  ;;  %p4141_p1 = scmp.lt.s32.totalorder %s519_s26, %s519_s26 }
 0x11e   : > { %p4142_p0 = scmp.lt.s32.totalorder %s4140_s13, %s4133_s3 }
 0x11f   : > { %p4136_p10 = pnand %p4134_p2, %p5508_p8 }
 0x120   : > { %p4143_p5 = por %p4142_p0, %p4141_p1 }
 0x121   : > { %p4137_p11 = pneg %p4136_p10 }
 0x123   : > { %p4144_p7 = pnand %p4143_p5, %p4137_p11 }
 0x125   : > { %4147 = shalt.err (!%p4144_p7)
}
 0x126   : > { %3699 = dma.hbm_to_vmem [thread:$0]  (!%p5509_p6), %s5437_s8, 16, %s519_s26, [#allocation15]  }
 0x127   : > { %s4148_s29 = scalar_lea.hbm %s5439_s10, 16 }
 0x128   : > { %p4149_p13 = scmp.ne.s32.totalorder %s5439_s10, %s4148_s29  ;;  %p4155_p12 = scmp.lt.u32.totalorder %s4148_s29, %s5439_s10 }
 0x12a   : > { %p4151_p9 = pnand %p4149_p13, %p5508_p8 }
 0x12c   : > { %p4152_p4 = pneg %p4151_p9 }
 0x12e   : > { %p4157_p3 = pnand %p4155_p12, %p4152_p4 }
 0x130   : > { %4160 = shalt.err (!%p4157_p3)
}
 0x131   : > { %s4161_s3 = scalar_lea.vmem %s543_s30, 16  ;;  %s4168_s26 = scalar_lea.vmem %s543_s30, 32 }
 0x132   : > { %p4162_p2 = scmp.ne.s32.totalorder %s543_s30, %s4161_s3  ;;  %p4169_p1 = scmp.lt.s32.totalorder %s543_s30, %s543_s30 }
 0x133   : > { %p4170_p0 = scmp.lt.s32.totalorder %s4168_s26, %s4161_s3 }
 0x134   : > { %p4164_p10 = pnand %p4162_p2, %p5508_p8 }
 0x135   : > { %p4171_p5 = por %p4170_p0, %p4169_p1 }
 0x136   : > { %p4165_p11 = pneg %p4164_p10 }
 0x138   : > { %p4172_p7 = pnand %p4171_p5, %p4165_p11 }
 0x13a   : > { %4175 = shalt.err (!%p4172_p7)
}
 0x13b   : > { %3705 = dma.hbm_to_vmem [thread:$0]  (!%p5509_p6), %s5439_s10, 16, %s543_s30, [#allocation18]  }
 0x13c   : > { %s4368_s2 = smov [#allocation22]   ;;  %s4176_s16 = scalar_lea.hbm %s5441_s12, 16 }
 0x13d   : > { %s566_s14 = sshll.u32 %s4368_s2, 4  ;;  %p4177_p13 = scmp.ne.s32.totalorder %s5441_s12, %s4176_s16  ;;  %s567_s14 = int_to_ptr.vmem [resolvable:$true] %s566_s14 }
 0x13e   : > { %p4183_p12 = scmp.lt.u32.totalorder %s4176_s16, %s5441_s12 }
 0x13f   : > { %p4179_p9 = pnand %p4177_p13, %p5508_p8 }
 0x141   : > { %p4180_p4 = pneg %p4179_p9 }
 0x143   : > { %p4185_p3 = pnand %p4183_p12, %p4180_p4 }
 0x145   : > { %4188 = shalt.err (!%p4185_p3)
}
 0x146   : > { %s4189_s30 = scalar_lea.vmem %s567_s14, 16  ;;  %s4196_s26 = scalar_lea.vmem %s567_s14, 32 }
 0x147   : > { %p4190_p2 = scmp.ne.s32.totalorder %s567_s14, %s4189_s30  ;;  %p4197_p1 = scmp.lt.s32.totalorder %s567_s14, %s567_s14 }
 0x148   : > { %p4198_p0 = scmp.lt.s32.totalorder %s4196_s26, %s4189_s30 }
 0x149   : > { %p4192_p10 = pnand %p4190_p2, %p5508_p8 }
 0x14a   : > { %p4199_p5 = por %p4198_p0, %p4197_p1 }
 0x14b   : > { %p4193_p11 = pneg %p4192_p10 }
 0x14d   : > { %p4200_p7 = pnand %p4199_p5, %p4193_p11 }
 0x14f   : > { %4203 = shalt.err (!%p4200_p7)
}
 0x150   : > { %3711 = dma.hbm_to_vmem [thread:$0]  (!%p5509_p6), %s5441_s12, 16, %s567_s14, [#allocation21]  }
 0x151   : > { %s5511_s2 = sshll.u32 %s4354_s27, 7  ;;  %s5512_s29 = sld [smem:[#allocation36_spill]] }
 0x152   : > { %s5513_s5 = sshll.u32 %s4673_s22, 3  ;;  %s590_s23 = scalar_lea.sflag [#allocation3], %s4673_s22 }
 0x153   : > { %s593_s1 = scalar_lea.vmem [#allocation2], %s5513_s5  ;;  %p5514_p13 = scmp.ne.s32.totalorder %s5506_s11, 0 }
 0x154   : > { %s600_s20 = sshll.u32 %s593_s1, 4  ;;  %s601_s20 = int_to_ptr.vmem [resolvable:$true] %s600_s20 }
 0x157   : > { %s4822_s16 = scalar_lea.hbm %s5512_s29, %s5511_s2  ;;  %s4209_s26 = scalar_lea.hbm %s5512_s29, 256 }
 0x158   : > { %s4204_s3 = scalar_lea.hbm %s4822_s16, 128  ;;  %p4210_p4 = scmp.lt.u32.totalorder %s4822_s16, %s5512_s29 }
 0x159   : > { %p4205_p8 = scmp.ne.s32.totalorder %s4822_s16, %s4204_s3  ;;  %p4211_p12 = scmp.lt.u32.totalorder %s4209_s26, %s4204_s3 }
 0x15a   : > { %p4213_p2 = scmp.lt.u32.totalorder %s4204_s3, %s4822_s16 }
 0x15b   : > { %p4207_p9 = pnand %p4205_p8, %p5514_p13  ;;  %p4212_p3 = por %p4211_p12, %p4210_p4 }
 0x15d   : > { %p4208_p6 = pneg %p4207_p9  ;;  %p4214_p10 = por %p4213_p2, %p4212_p3 }
 0x15f   : > { %p4215_p11 = pnand %p4214_p10, %p4208_p6 }
 0x161   : > { %4218 = shalt.err (!%p4215_p11)
}
 0x162   : > { %s4219_s2 = scalar_lea.vmem %s601_s20, 128  ;;  %s4369_s18 = smov [#allocation2]  }
 0x163   : > { %p4220_p1 = scmp.ne.s32.totalorder %s601_s20, %s4219_s2  ;;  %s4224_s21 = sshll.u32 %s4369_s18, 4  ;;  %s4225_s21 = int_to_ptr.vmem [resolvable:$false] %s4224_s21 }
 0x164   : > { %s4226_s5 = scalar_lea.vmem %s4225_s21, 256  ;;  %p4227_p7 = scmp.lt.s32.totalorder %s601_s20, %s4225_s21 }
 0x165   : > { %p4222_p0 = pnand %p4220_p1, %p5514_p13  ;;  %p4228_p8 = scmp.lt.s32.totalorder %s4226_s5, %s4219_s2 }
 0x167   : > { %p4223_p5 = pneg %p4222_p0  ;;  %p4229_p9 = por %p4228_p8, %p4227_p7 }
 0x169   : > { %p4230_p4 = pnand %p4229_p9, %p4223_p5 }
 0x16b   : > { %4233 = shalt.err (!%p4230_p4)
}
 0x16c   : > { %p5515_p12 = scmp.ne.s32.totalorder %s5504_s19, 0  ;;  %s3390_s1 = sshll.u32 %s4354_s27, 4 }
 0x16d   : > { %s628_s3 = scalar_lea.vmem [#allocation7], %s4673_s22  ;;  %s5516_s13 = sld [smem:[#allocation38_spill]] }
 0x16e   : > { %3715 = dma.hbm_to_vmem [thread:$0]  (!%p5515_p12), %s4822_s16, 128, %s601_s20, %s590_s23  }
 0x16f   : > { %s635_s14 = sshll.u32 %s628_s3, 4  ;;  %s636_s14 = int_to_ptr.vmem [resolvable:$true] %s635_s14 }
 0x173   : > { %s633_s9 = scalar_lea.hbm %s5516_s13, %s3390_s1  ;;  %s4239_s5 = scalar_lea.hbm %s5516_s13, 32 }
 0x174   : > { %s4234_s18 = scalar_lea.hbm %s633_s9, 16  ;;  %p4240_p10 = scmp.lt.u32.totalorder %s633_s9, %s5516_s13 }
 0x175   : > { %p4235_p6 = scmp.ne.s32.totalorder %s633_s9, %s4234_s18  ;;  %p4241_p11 = scmp.lt.u32.totalorder %s4239_s5, %s4234_s18 }
 0x176   : > { %p4243_p0 = scmp.lt.u32.totalorder %s4234_s18, %s633_s9 }
 0x177   : > { %p4237_p3 = pnand %p4235_p6, %p5514_p13  ;;  %p4242_p1 = por %p4241_p11, %p4240_p10 }
 0x179   : > { %p4238_p2 = pneg %p4237_p3  ;;  %p4244_p5 = por %p4243_p0, %p4242_p1 }
 0x17b   : > { %p4245_p7 = pnand %p4244_p5, %p4238_p2 }
 0x17d   : > { %4248 = shalt.err (!%p4245_p7)
}
 0x17e   : > { %s4249_s22 = scalar_lea.vmem %s636_s14, 16  ;;  %s4370_s16 = smov [#allocation7]  }
 0x17f   : > { %p4250_p8 = scmp.ne.s32.totalorder %s636_s14, %s4249_s22  ;;  %s4254_s20 = sshll.u32 %s4370_s16, 4  ;;  %s4255_s20 = int_to_ptr.vmem [resolvable:$false] %s4254_s20 }
 0x180   : > { %s4256_s23 = scalar_lea.vmem %s4255_s20, 32  ;;  %p4257_p6 = scmp.lt.s32.totalorder %s636_s14, %s4255_s20 }
 0x181   : > { %p4252_p9 = pnand %p4250_p8, %p5514_p13  ;;  %p4258_p3 = scmp.lt.s32.totalorder %s4256_s23, %s4249_s22 }
 0x183   : > { %p4253_p4 = pneg %p4252_p9  ;;  %p4259_p12 = por %p4258_p3, %p4257_p6 }
 0x185   : > { %p4260_p10 = pnand %p4259_p12, %p4253_p4 }
 0x187   : > { %4263 = shalt.err (!%p4260_p10)
}
 0x188   : > { %p5517_p11 = scmp.ne.s32.totalorder %s5504_s19, 0  ;;  %s5518_s4 = sld [smem:[#allocation33_spill]] }
 0x18a   : > { %3721 = dma.hbm_to_vmem [thread:$0]  (!%p5517_p11), %s633_s9, 16, %s636_s14, %s4697_s7  }
 0x18e   : > { %p5519_p2 = scmp.ne.s32.totalorder %s5518_s4, 0 }
 0x18f   : > { %s4865_s6 = sand.u32 (!%p5519_p2), 1, %s4346_s25   ;;  %p5520_p13 = scmp.ne.s32.totalorder (!%p5519_p2), %s5501_s17, 0 }
 0x190   : > { %644 = sbr.rel (%p5519_p2) target bundleno = 4485 (0x1185), region = 88  ;;  %s4868_s11 = sshll.u32 (!%p5519_p2), %s4865_s6, 3 }
 0x191   : > { %s647_s1 = scalar_lea.sflag (!%p5519_p2), [#allocation3], %s4865_s6  ;;  %s650_s3 = scalar_lea.vmem (!%p5519_p2), [#allocation2], %s4868_s11 }
 0x197   : > { %4309 = dma.done.wait (%p5520_p13), %s647_s1, 128  }
 0x198   : > { %4311 = vsyncadd (%p5520_p13), %s647_s1, 4294967168  ;;  %s655_s7 = sand.u32 1, %s4495_s0   ;;  %s659_s14 = scalar_lea.vmem [#allocation5], %s4868_s11 }
 0x199   : > { %s656_s19 = scalar_lea.sflag [#allocation6], %s655_s7 }
 0x19a   : > { %4313 = dma.done.wait (%p5520_p13), %s656_s19, 144  }
 0x19b   : > { %4315 = vsyncadd (%p5520_p13), %s656_s19, 4294967152  ;;  %s667_s30 = scalar_lea.vmem [#allocation7], %s4865_s6  ;;  %p5521_p12 = scmp.eq.s32.totalorder %s4495_s0, 0 }
 0x19d   : > { %4317 = dma.done.wait (%p5521_p12), [#allocation9], 272   ;;  %p5522_p1 = pmov %p5521_p12 }
 0x19f   : > { %4319 = vsyncadd (%p5522_p1), [#allocation9], 4294967024  ;;  %p5523_p0 = pmov %p5522_p1 }
 0x1a1   : > { %4321 = dma.done.wait (%p5523_p0), [#allocation12], 272   ;;  %p5524_p5 = pmov %p5523_p0 }
 0x1a2   : > { %p5525_p7 = pmov %p5523_p0 }
 0x1a3   : > { %4323 = vsyncadd (%p5524_p5), [#allocation12], 4294967024 }
 0x1a4   : > { %4325 = dma.done.wait (%p5525_p7), [#allocation15], 272   ;;  %p5526_p8 = pmov %p5523_p0 }
 0x1a5   : > { %p5527_p9 = pmov %p5523_p0 }
 0x1a6   : > { %4327 = vsyncadd (%p5526_p8), [#allocation15], 4294967024 }
 0x1a7   : > { %4329 = dma.done.wait (%p5527_p9), [#allocation18], 272   ;;  %p5528_p4 = pmov %p5523_p0 }
 0x1a8   : > { %p5529_p6 = pmov %p5523_p0 }
 0x1a9   : > { %4331 = vsyncadd (%p5528_p4), [#allocation18], 4294967024 }
 0x1aa   : > { %4333 = dma.done.wait (%p5529_p6), [#allocation21], 272   ;;  %p5530_p3 = pmov %p5523_p0 }
 0x1ab   : > { %vm813_vm0 = vcmask 261120   ;;  %v4903_v0 = vld [vmem:[%s650_s3] sm:$0xff]  ;;  %v4371_v8 = vmov 0.0   ;;  %vm4372_vm1 = vmmov 0   ;;  %v828_v12 = vlaneseq  ;;  %s5531_s9 = sld [smem:[#allocation46_spill]]  ;;  %s5532_s21 = sld [smem:[#allocation47_spill]] }
 0x1ac   : > { %4335 = vsyncadd (%p5530_p3), [#allocation21], 4294967024  ;;  %v814_v1 = vsel %vm813_vm0, %v4903_v0, 0.0  ;;  %v3804_v7 = vld [vmem:[#allocation8] sm:$0xff]   ;;  %3506 = vmatprep.subr.bf16.mxu0 %v4371_v8  ;;  %3510 = vmatprep.mubr.msk.bf16.mxu0 %vm4372_vm1, %v4371_v8  ;;  %v3805_v9 = vld [vmem:[#allocation8 + $0x8] sm:$0xff]   ;;  %s4373_s5 = smov 104  }
 0x1ad   : > { %815 = vadd.xlane.f32.xlu0 %v814_v1  ;;  %3507 = vmatpush3.bf16.msra.mxu0 %v3804_v7  ;;  %v4918_v14 = vshrl.u32 %v828_v12, 7  ;;  %v3406_v25 = vld [vmem:[#allocation10] ss:$0 sm:$0xff]  ;;  %s4374_s22 = smov 120   ;;  %s4375_s16 = smov 112   ;;  %vm1354_vm2 = vcmask 64512  }
 0x1ae   : > { %3514 = vmatprep.subr.bf16.mxu1 %v4371_v8  ;;  %3508 = vmatprep.subr.bf16.mxu0 %v4371_v8  ;;  %s4376_s20 = smov 96   ;;  %v4377_v34 = vmov 1983009808   ;;  %v4378_v38 = vmov 1934713408   ;;  %s4379_s23 = smov 64  }
 0x1af   : > { %3516 = vmatprep.mubr.msk.bf16.mxu1 %vm4372_vm1, %v4371_v8  ;;  %v4921_v15 = vsub.s32 0, %v4918_v14  ;;  %v913_v35 = vunpack.c.l.s4 %v4377_v34  ;;  %v945_v39 = vunpack.c.l.s4 %v4378_v38  ;;  %vm1604_vm3 = vcmask 1043456   ;;  %s4380_s4 = smov 16   ;;  %s4381_s1 = smov 8  }
 0x1b0   : > { %s4382_s3 = smov 24   ;;  %vm1935_vm4 = vcmask 130048   ;;  %vm1937_vm5 = vcmask 195584   ;;  %vm2393_vm6 = vcmask 60416   ;;  %s5533_s2 = sld [smem:[#allocation48_spill]] }
 0x1b1   : > { %3509 = vmatpush3.bf16.msra.mxu0 %v3805_v9  ;;  %v4926_v16 = vld [vmem:[%s5531_s9] sm:$0xf]  ;;  %v914_v36 = vunpack.c.0.s8 %v913_v35  ;;  %v946_v46 = vunpack.c.0.s8 %v945_v39  ;;  %s5534_s17 = sld [smem:[#allocation49_spill]]  ;;  %s3457_s26 = sshll.u32 %s4495_s0, 7 }
 0x1b2   : > { %3520 = vmatprep.subr.bf16.mxu0 %v4371_v8  ;;  %v4931_v17 = vld [vmem:[%s5532_s21] sm:$0xf]  ;;  %v831_v18 = vrot.slane %v4926_v16, %v4921_v15  ;;  %s766_s18 = scalar_lea.vmem [#allocation23], %s4868_s11  ;;  %p5536_p11 = scmp.ne.s32.totalorder %s5502_s15, 0 }
 0x1b3   : > { %v836_v21 = vrot.slane %v4931_v17, %v4921_v15  ;;  %v4967_v42 = vsub.s32 %v914_v36, %v4918_v14  ;;  %v4978_v52 = vsub.s32 %v946_v46, %v4918_v14  ;;  %s4383_s11 = smov [#allocation23]  }
 0x23a   : > { %v816_v2 = vpop.xlane.xlu0 %815 }
 0x23b   : > { %v818_v3 = vmul.f32 0.03125, %v816_v2 }
 0x23d   : > { %v819_v4 = vsub.f32 %v4903_v0, %v818_v3 }
 0x23f   : > { %v820_v5 = vmul.f32 %v819_v4, %v819_v4 }
 0x241   : > { %v821_v6 = vsel %vm813_vm0, %v820_v5, 0.0 }
 0x242   : > { %822 = vadd.xlane.f32.xlu0 %v821_v6 }
 0x2cf   : > { %v823_v10 = vpop.xlane.xlu0 %822 }
 0x2d0   : > { %v824_v11 = vmul.f32 0.03125, %v823_v10 }
 0x2d2   : > { %v825_v13 = vadd.f32 1e-06, %v824_v11 }
 0x2d4   : > { %3820 = vrsqrt.f32 %v825_v13 }
 0x2de   : > { %v3821_v19 = vpop.eup %3820 }
 0x2df   : > { %v827_v20 = vmul.f32 %v3821_v19, %v819_v4 }
 0x2e1   : > { %v832_v22 = vmul.f32 %v831_v18, %v827_v20 }
 0x2e3   : > { %v837_v23 = vadd.f32 %v836_v21, %v832_v22 }
 0x2e5   : > { %v838_v24 = vpack.c.bf16 %v837_v23, %v837_v23 }
 0x2e7   : > { %3511 = vmatmul.mubr.msk.bf16.vlgmr.msra.gmra.mrb[0].mxu0 %vm813_vm0, %v838_v24 }
 0x2e8   : > { %3522 = vmatprep.mubr.msk.bf16.mxu0 %vm4372_vm1, %v4371_v8 }
 0x3ba   : > { %v894_v26 = vpop.f32.mrb[0].mxu0 }
 0x3bb   : > { %v4940_v27 = vadd.f32 %v3406_v25, %v894_v26  ;;  %v3512_v28 = vpop.f32.mrb[1].mxu0 }
 0x3bc   : > { %v897_v29 = vpop.f32.mrb[2].mxu0 }
 0x3bd   : > { %907 = vrot.lane.b32.xlu0 %v4940_v27, %s4373_s5  ;;  %901 = vrot.lane.b32.xlu1 %v4940_v27, %s4374_s22  ;;  %v3513_v30 = vpop.f32.mrb[3].mxu0 }
 0x3c1   : > { %904 = vrot.lane.b32.xlu1 %v4940_v27, %s4375_s16 }
 0x3c5   : > { %1046 = vrot.lane.b32.xlu1 %v4940_v27, %s4376_s20 }
 0x42f   : > { %v4950_v31 = vpop.permute.xlu1 %901  ;;  %v4958_v33 = vpop.permute.xlu0 %907 }
 0x430   : > { %1048 = vrot.lane.b32.xlu1 %v4950_v31, %s4376_s20  ;;  %v926_v43 = vcombine.low %v4950_v31, %v4958_v33  ;;  %v927_v44 = vcombine.high %v4950_v31, %v4958_v33 }
 0x432   : > { %v934_v49 = vrot.slane %v926_v43, %v4967_v42  ;;  %v941_v50 = vrot.slane %v927_v44, %v4967_v42 }
 0x433   : > { %v4954_v32 = vpop.permute.xlu1 %904 }
 0x434   : > { %1050 = vrot.lane.b32.xlu1 %v4954_v32, %s4376_s20  ;;  %v910_v40 = vcombine.low %v4940_v27, %v4954_v32  ;;  %v911_v41 = vcombine.high %v4940_v27, %v4954_v32 }
 0x436   : > { %v918_v47 = vrot.slane %v910_v40, %v4967_v42  ;;  %v925_v48 = vrot.slane %v911_v41, %v4967_v42 }
 0x437   : > { %v1047_v37 = vpop.permute.xlu1 %1046 }
 0x438   : > { %1052 = vrot.lane.b32.xlu1 %v4958_v33, %s4376_s20  ;;  %v942_v53 = vcombine.low %v918_v47, %v934_v49  ;;  %v943_v54 = vcombine.high %v918_v47, %v934_v49  ;;  %v958_v55 = vcombine.low %v925_v48, %v941_v50  ;;  %v959_v56 = vcombine.high %v925_v48, %v941_v50 }
 0x43a   : > { %v950_v62 = vrot.slane %v942_v53, %v4978_v52  ;;  %v957_v63 = vrot.slane %v943_v54, %v4978_v52  ;;  %v966_v1 = vrot.slane %v958_v55, %v4978_v52  ;;  %v973_v2 = vrot.slane %v959_v56, %v4978_v52 }
 0x43c   : > { %v978_v13 = vcombine.low %v950_v62, %v957_v63  ;;  %v3410_v18 = vcombine.high %v950_v62, %v957_v63  ;;  %v994_v19 = vcombine.low %v966_v1, %v973_v2  ;;  %v3411_v20 = vcombine.high %v966_v1, %v973_v2 }
 0x43e   : > { %v985_v30 = vrot.slane %v978_v13, %v4967_v42  ;;  %v993_v34 = vrot.slane %v3410_v18, %v4967_v42  ;;  %v1001_v35 = vrot.slane %v994_v19, %v4967_v42  ;;  %v1009_v36 = vrot.slane %v3411_v20, %v4967_v42 }
 0x440   : > { %v1010_v48 = vcombine.low %v985_v30, %v993_v34  ;;  %v1026_v49 = vcombine.low %v1001_v35, %v1009_v36  ;;  %v1011_v63 = vcombine.high %v985_v30, %v993_v34  ;;  %v1027_v1 = vcombine.high %v1001_v35, %v1009_v36 }
 0x4a2   : > { %v1049_v45 = vpop.permute.xlu1 %1048 }
 0x4a6   : > { %v1051_v51 = vpop.permute.xlu1 %1050 }
 0x4a7   : > { %v1058_v57 = vcombine.low %v1047_v37, %v1051_v51  ;;  %v1059_v58 = vcombine.high %v1047_v37, %v1051_v51 }
 0x4a9   : > { %v1066_v3 = vrot.slane %v1058_v57, %v4967_v42  ;;  %v1073_v4 = vrot.slane %v1059_v58, %v4967_v42  ;;  %v1018_v57 = vrot.slane %v1010_v48, %v4978_v52  ;;  %v1034_v58 = vrot.slane %v1026_v49, %v4978_v52 }
 0x4aa   : > { %v1053_v59 = vpop.permute.xlu1 %1052 }
 0x4ab   : > { %v1074_v60 = vcombine.low %v1049_v45, %v1053_v59  ;;  %v1075_v61 = vcombine.high %v1049_v45, %v1053_v59  ;;  %v1042_v2 = vcombine.low %v1018_v57, %v1034_v58 }
 0x4ad   : > { %v1082_v5 = vrot.slane %v1074_v60, %v4967_v42  ;;  %v1089_v6 = vrot.slane %v1075_v61, %v4967_v42 }
 0x4af   : > { %v1090_v7 = vcombine.low %v1066_v3, %v1082_v5  ;;  %v1091_v9 = vcombine.high %v1066_v3, %v1082_v5  ;;  %v1106_v10 = vcombine.low %v1073_v4, %v1089_v6  ;;  %v1107_v11 = vcombine.high %v1073_v4, %v1089_v6 }
 0x4b0   : > { %v1043_v3 = vcombine.high %v1018_v57, %v1034_v58  ;;  %v1346_v6 = vpack.c.bf16 %v1042_v2, %v1042_v2 }
 0x4b1   : > { %v1098_v21 = vrot.slane %v1090_v7, %v4978_v52  ;;  %v1105_v22 = vrot.slane %v1091_v9, %v4978_v52  ;;  %v1114_v23 = vrot.slane %v1106_v10, %v4978_v52  ;;  %v1121_v24 = vrot.slane %v1107_v11, %v4978_v52 }
 0x4b2   : > { %v1347_v7 = vpack.c.bf16 %v1043_v3, %v1043_v3  ;;  %v1025_v9 = vrot.slane %v1011_v63, %v4978_v52  ;;  %v1041_v10 = vrot.slane %v1027_v1, %v4978_v52 }
 0x4b3   : > { %v1126_v25 = vcombine.low %v1098_v21, %v1105_v22  ;;  %v3412_v26 = vcombine.high %v1098_v21, %v1105_v22  ;;  %v1142_v28 = vcombine.low %v1114_v23, %v1121_v24  ;;  %v3413_v29 = vcombine.high %v1114_v23, %v1121_v24  ;;  %v810_v22 = vld [vmem:[%s667_s30] sm:$0x1] }
 0x4b4   : > { %v1044_v18 = vcombine.low %v1025_v9, %v1041_v10  ;;  %v1045_v19 = vcombine.high %v1025_v9, %v1041_v10  ;;  %v3405_v23 = vadd.f32 -1.0, %v810_v22 }
 0x4b5   : > { %v1133_v37 = vrot.slane %v1126_v25, %v4967_v42  ;;  %v1141_v38 = vrot.slane %v3412_v26, %v4967_v42  ;;  %v1149_v39 = vrot.slane %v1142_v28, %v4967_v42  ;;  %v1157_v40 = vrot.slane %v3413_v29, %v4967_v42 }
 0x4b6   : > { %v1348_v20 = vpack.c.bf16 %v1044_v18, %v1044_v18  ;;  %v1349_v21 = vpack.c.bf16 %v1045_v19, %v1045_v19  ;;  %v812_v24 = vmul.f32 1e+09, %v3405_v23 }
 0x4b7   : > { %v1158_v41 = vcombine.low %v1133_v37, %v1141_v38  ;;  %v1174_v43 = vcombine.low %v1149_v39, %v1157_v40  ;;  %v1159_v44 = vcombine.high %v1133_v37, %v1141_v38  ;;  %v1175_v45 = vcombine.high %v1149_v39, %v1157_v40 }
 0x4b8   : > { %v1547_v25 = vrot.slane %v812_v24, %v4921_v15 }
 0x4b9   : > { %v1166_v46 = vrot.slane %v1158_v41, %v4978_v52  ;;  %v1182_v47 = vrot.slane %v1174_v43, %v4978_v52  ;;  %v1173_v53 = vrot.slane %v1159_v44, %v4978_v52  ;;  %v1189_v54 = vrot.slane %v1175_v45, %v4978_v52 }
 0x4bb   : > { %v1190_v50 = vcombine.low %v1166_v46, %v1182_v47  ;;  %v1191_v51 = vcombine.high %v1166_v46, %v1182_v47  ;;  %v1192_v61 = vcombine.low %v1173_v53, %v1189_v54  ;;  %v1193_v62 = vcombine.high %v1173_v53, %v1189_v54 }
 0x4bd   : > { %v1350_v55 = vpack.c.bf16 %v1190_v50, %v1190_v50  ;;  %v1351_v56 = vpack.c.bf16 %v1191_v51, %v1191_v51  ;;  %v1352_v4 = vpack.c.bf16 %v1192_v61, %v1192_v61  ;;  %v1353_v5 = vpack.c.bf16 %v1193_v62, %v1193_v62 }
 0x4bf   : > { %v1359_v59 = vsel %vm1354_vm2, %v1350_v55, 0  ;;  %v1405_v60 = vsel %vm1354_vm2, %v1351_v56, 0  ;;  %v1451_v11 = vsel %vm1354_vm2, %v1352_v4, 0  ;;  %v1497_v13 = vsel %vm1354_vm2, %v1353_v5, 0 }
 0x4c0   : > { %3515 = vmatpush3.bf16.xpose.msra.mxu1 %v1359_v59  ;;  %3521 = vmatpush3.bf16.xpose.msra.mxu0 %v1405_v60 }
 0x4c1   : > { %3526 = vmatprep.subr.bf16.mxu1 %v4371_v8  ;;  %3532 = vmatprep.subr.bf16.mxu0 %v4371_v8 }
 0x4c7   : > { %3517 = vmatmul.mubr.msk.bf16.vlgmr.msra.gmra.mrb[0].mxu1 %vm1354_vm2, %v1346_v6  ;;  %3523 = vmatmul.mubr.msk.bf16.vlgmr.msra.gmra.mrb[4].mxu0 %vm1354_vm2, %v1347_v7 }
 0x4c8   : > { %3527 = vmatpush3.bf16.xpose.msra.mxu1 %v1451_v11  ;;  %3533 = vmatpush3.bf16.xpose.msra.mxu0 %v1497_v13 }
 0x4c9   : > { %3528 = vmatprep.mubr.msk.bf16.mxu1 %vm4372_vm1, %v4371_v8  ;;  %3534 = vmatprep.mubr.msk.bf16.mxu0 %vm4372_vm1, %v4371_v8 }
 0x4ca   : > { %3538 = vmatprep.subr.bf16.mxu1 %v4371_v8  ;;  %3544 = vmatprep.subr.bf16.mxu0 %v4371_v8 }
 0x4cf   : > { %3529 = vmatmul.mubr.msk.bf16.vlgmr.msra.gmra.mrb[4].mxu1 %vm1354_vm2, %v1348_v20  ;;  %3535 = vmatmul.mubr.msk.bf16.vlgmr.msra.gmra.mrb[8].mxu0 %vm1354_vm2, %v1349_v21 }
 0x4d0   : > { %3540 = vmatprep.mubr.msk.bf16.mxu1 %vm4372_vm1, %v4371_v8  ;;  %3546 = vmatprep.mubr.msk.bf16.mxu0 %vm4372_vm1, %v4371_v8 }
 0x59a   : > { %v1395_v26 = vpop.f32.mrb[0].mxu1  ;;  %v1441_v28 = vpop.f32.mrb[4].mxu0 }
 0x59b   : > { %v1539_v29 = vmul.f32 0.35355338, %v1395_v26  ;;  %v1540_v30 = vmul.f32 0.35355338, %v1441_v28  ;;  %v3518_v34 = vpop.f32.mrb[1].mxu1  ;;  %v3524_v35 = vpop.f32.mrb[5].mxu0 }
 0x59c   : > { %v1398_v36 = vpop.f32.mrb[2].mxu1  ;;  %v1444_v37 = vpop.f32.mrb[6].mxu0 }
 0x59d   : > { %v3519_v38 = vpop.f32.mrb[3].mxu1  ;;  %v3525_v39 = vpop.f32.mrb[7].mxu0  ;;  %v1549_v40 = vadd.f32 %v1547_v25, %v1539_v29  ;;  %v1550_v41 = vadd.f32 %v1547_v25, %v1540_v30 }
 0x59f   : > { %v1553_v43 = vsel %vm1354_vm2, %v1549_v40, -inf  ;;  %v1556_v44 = vsel %vm1354_vm2, %v1550_v41, -inf }
 0x5a0   : > { %1554 = vmax.xlane.f32.xlu1 %v1553_v43  ;;  %1557 = vmax.xlane.f32.xlu0 %v1556_v44 }
 0x5a2   : > { %v1487_v45 = vpop.f32.mrb[4].mxu1  ;;  %v1533_v15 = vpop.f32.mrb[8].mxu0 }
 0x5a3   : > { %v1541_v46 = vmul.f32 0.35355338, %v1487_v45  ;;  %v1542_v47 = vmul.f32 0.35355338, %v1533_v15  ;;  %v3530_v48 = vpop.f32.mrb[5].mxu1  ;;  %v3536_v49 = vpop.f32.mrb[9].mxu0 }
 0x5a4   : > { %v1490_v50 = vpop.f32.mrb[6].mxu1  ;;  %v1536_v51 = vpop.f32.mrb[10].mxu0 }
 0x5a5   : > { %v3531_v53 = vpop.f32.mrb[7].mxu1  ;;  %v3537_v54 = vpop.f32.mrb[11].mxu0  ;;  %v1551_v55 = vadd.f32 %v1547_v25, %v1541_v46  ;;  %v1552_v56 = vadd.f32 %v1547_v25, %v1542_v47 }
 0x5a7   : > { %v1559_v57 = vsel %vm1354_vm2, %v1551_v55, -inf  ;;  %v1562_v58 = vsel %vm1354_vm2, %v1552_v56, -inf }
 0x5a8   : > { %1560 = vmax.xlane.f32.xlu1 %v1559_v57  ;;  %1563 = vmax.xlane.f32.xlu0 %v1562_v58 }
 0x5b9   : > { %1194 = vrot.lane.b32.xlu1 %v4940_v27, %s4379_s23 }
 0x62d   : > { %v1555_v59 = vpop.xlane.xlu1 %1554  ;;  %v1558_v60 = vpop.xlane.xlu0 %1557 }
 0x62e   : > { %v1565_v61 = vsub.f32 %v1549_v40, %v1555_v59  ;;  %v1566_v62 = vsub.f32 %v1550_v41, %v1558_v60 }
 0x630   : > { %v1569_v63 = vmul.f32 1.442695, %v1565_v61  ;;  %v1571_v1 = vmul.f32 1.442695, %v1566_v62 }
 0x632   : > { %3822 = vpow2.f32 %v1569_v63 }
 0x633   : > { %3824 = vpow2.f32 %v1571_v1 }
 0x635   : > { %v1561_v27 = vpop.xlane.xlu1 %1560  ;;  %v1564_v7 = vpop.xlane.xlu0 %1563 }
 0x636   : > { %v1567_v6 = vsub.f32 %v1551_v55, %v1561_v27  ;;  %v1568_v9 = vsub.f32 %v1552_v56, %v1564_v7 }
 0x638   : > { %v1573_v10 = vmul.f32 1.442695, %v1567_v6  ;;  %v1575_v11 = vmul.f32 1.442695, %v1568_v9 }
 0x63a   : > { %3826 = vpow2.f32 %v1573_v10 }
 0x63b   : > { %3828 = vpow2.f32 %v1575_v11 }
 0x63c   : > { %v5036_v2 = vpop.eup %3822 }
 0x63d   : > { %v5038_v3 = vpop.eup %3824  ;;  %v1577_v4 = vsel %vm1354_vm2, %v5036_v2, 0.0 }
 0x63e   : > { %1578 = vadd.xlane.f32.xlu1 %v1577_v4  ;;  %v1580_v5 = vsel %vm1354_vm2, %v5038_v3, 0.0 }
 0x63f   : > { %1581 = vadd.xlane.f32.xlu0 %v1580_v5 }
 0x644   : > { %v5047_v13 = vpop.eup %3826 }
 0x645   : > { %v5049_v18 = vpop.eup %3828  ;;  %v1583_v19 = vsel %vm1354_vm2, %v5047_v13, 0.0 }
 0x64f   : > { %1198 = vrot.lane.b32.xlu1 %v4954_v32, %s4379_s23  ;;  %v1586_v32 = vsel %vm1354_vm2, %v5049_v18, 0.0 }
 0x653   : > { %1200 = vrot.lane.b32.xlu1 %v4958_v33, %s4379_s23 }
 0x655   : > { %1196 = vrot.lane.b32.xlu0 %v4950_v31, %s4379_s23  ;;  %v1195_v31 = vpop.permute.xlu1 %1194  ;;  %s3155_s23 = scalar_lea.sflag [#allocation4], %s4865_s6 }
 0x674   : > { %1584 = vadd.xlane.f32.xlu0 %v1583_v19 }
 0x677   : > { %1587 = vadd.xlane.f32.xlu1 %v1586_v32 }
 0x6cb   : > { %v1579_v33 = vpop.xlane.xlu1 %1578 }
 0x6cc   : > { %v1582_v20 = vpop.xlane.xlu0 %1581  ;;  %3830 = vrcp.f32 %v1579_v33 }
 0x6cd   : > { %3832 = vrcp.f32 %v1582_v20 }
 0x6cf   : > { %v1199_v21 = vpop.permute.xlu1 %1198 }
 0x6d0   : > { %v1206_v22 = vcombine.low %v1195_v31, %v1199_v21  ;;  %v1207_v23 = vcombine.high %v1195_v31, %v1199_v21  ;;  %v1197_v24 = vpop.permute.xlu0 %1196 }
 0x6d2   : > { %v1214_v29 = vrot.slane %v1206_v22, %v4967_v42  ;;  %v1221_v30 = vrot.slane %v1207_v23, %v4967_v42 }
 0x6d3   : > { %v1201_v25 = vpop.permute.xlu1 %1200 }
 0x6d4   : > { %v1222_v26 = vcombine.low %v1197_v24, %v1201_v25  ;;  %v1223_v28 = vcombine.high %v1197_v24, %v1201_v25 }
 0x6d6   : > { %v1230_v34 = vrot.slane %v1222_v26, %v4967_v42  ;;  %v1237_v35 = vrot.slane %v1223_v28, %v4967_v42  ;;  %v3831_v59 = vpop.eup %3830 }
 0x6d7   : > { %v3833_v62 = vpop.eup %3832  ;;  %v1590_v27 = vmul.f32 %v3831_v59, %v5036_v2  ;;  %v3806_v59 = vld [vmem:[#allocation11] sm:$0xff]  }
 0x6d8   : > { %v1238_v36 = vcombine.low %v1214_v29, %v1230_v34  ;;  %v1239_v37 = vcombine.high %v1214_v29, %v1230_v34  ;;  %v1254_v38 = vcombine.low %v1221_v30, %v1237_v35  ;;  %v1255_v39 = vcombine.high %v1221_v30, %v1237_v35 }
 0x6d9   : > { %v1592_v6 = vmul.f32 %v3833_v62, %v5038_v3  ;;  %v1597_v31 = vpack.c.bf16 %v1590_v27, %v1590_v27 }
 0x6da   : > { %v1246_v40 = vrot.slane %v1238_v36, %v4978_v52  ;;  %v1253_v41 = vrot.slane %v1239_v37, %v4978_v52  ;;  %v1262_v43 = vrot.slane %v1254_v38, %v4978_v52  ;;  %v1269_v44 = vrot.slane %v1255_v39, %v4978_v52 }
 0x6db   : > { %v1598_v33 = vpack.c.bf16 %v1592_v6, %v1592_v6  ;;  %v3807_v6 = vld [vmem:[#allocation11 + $0x8] sm:$0xff]  }
 0x6dc   : > { %v1274_v45 = vcombine.low %v1246_v40, %v1253_v41  ;;  %v3414_v15 = vcombine.high %v1246_v40, %v1253_v41  ;;  %v1290_v46 = vcombine.low %v1262_v43, %v1269_v44  ;;  %v3415_v47 = vcombine.high %v1262_v43, %v1269_v44 }
 0x6de   : > { %v1281_v48 = vrot.slane %v1274_v45, %v4967_v42  ;;  %v1289_v49 = vrot.slane %v3414_v15, %v4967_v42  ;;  %v1297_v50 = vrot.slane %v1290_v46, %v4967_v42  ;;  %v1305_v51 = vrot.slane %v3415_v47, %v4967_v42 }
 0x6e0   : > { %v1306_v53 = vcombine.low %v1281_v48, %v1289_v49  ;;  %v1307_v54 = vcombine.high %v1281_v48, %v1289_v49  ;;  %v1322_v55 = vcombine.low %v1297_v50, %v1305_v51  ;;  %v1323_v56 = vcombine.high %v1297_v50, %v1305_v51 }
 0x6e2   : > { %v1314_v57 = vrot.slane %v1306_v53, %v4978_v52  ;;  %v1321_v58 = vrot.slane %v1307_v54, %v4978_v52  ;;  %v1330_v60 = vrot.slane %v1322_v55, %v4978_v52  ;;  %v1337_v61 = vrot.slane %v1323_v56, %v4978_v52 }
 0x6e4   : > { %v1338_v63 = vcombine.low %v1314_v57, %v1330_v60  ;;  %v1339_v1 = vcombine.high %v1314_v57, %v1330_v60  ;;  %v1340_v4 = vcombine.low %v1321_v58, %v1337_v61  ;;  %v1341_v5 = vcombine.high %v1321_v58, %v1337_v61 }
 0x6e6   : > { %v1342_v7 = vpack.c.bf16 %v1338_v63, %v1338_v63  ;;  %v1343_v9 = vpack.c.bf16 %v1339_v1, %v1339_v1  ;;  %v1344_v19 = vpack.c.bf16 %v1340_v4, %v1340_v4  ;;  %v1345_v32 = vpack.c.bf16 %v1341_v5, %v1341_v5 }
 0x6e8   : > { %v1606_v10 = vsel %vm1604_vm3, %v1342_v7, 0  ;;  %v1652_v11 = vsel %vm1604_vm3, %v1343_v9, 0  ;;  %v1698_v2 = vsel %vm1604_vm3, %v1344_v19, 0  ;;  %v1744_v3 = vsel %vm1604_vm3, %v1345_v32, 0 }
 0x6e9   : > { %3539 = vmatpush3.bf16.msra.mxu1 %v1606_v10  ;;  %3545 = vmatpush3.bf16.msra.mxu0 %v1652_v11 }
 0x6ea   : > { %3550 = vmatprep.subr.bf16.mxu1 %v4371_v8  ;;  %3556 = vmatprep.subr.bf16.mxu0 %v4371_v8 }
 0x6ec   : > { %3541 = vmatmul.mubr.msk.bf16.vlgmr.msra.gmra.mrb[8].mxu1 %vm1354_vm2, %v1597_v31  ;;  %3547 = vmatmul.mubr.msk.bf16.vlgmr.msra.gmra.mrb[12].mxu0 %vm1354_vm2, %v1598_v33 }
 0x6ed   : > { %3551 = vmatpush3.bf16.msra.mxu1 %v1698_v2  ;;  %3557 = vmatpush3.bf16.msra.mxu0 %v1744_v3 }
 0x6ee   : > { %3552 = vmatprep.mubr.msk.bf16.mxu1 %vm4372_vm1, %v4371_v8  ;;  %3558 = vmatprep.mubr.msk.bf16.mxu0 %vm4372_vm1, %v4371_v8 }
 0x6ef   : > { %3562 = vmatprep.subr.bf16.mxu1 %v4371_v8  ;;  %3570 = vmatprep.subr.bf16.mxu0 %v4371_v8 }
 0x701   : > { %v1585_v20 = vpop.xlane.xlu0 %1584 }
 0x702   : > { %3834 = vrcp.f32 %v1585_v20 }
 0x704   : > { %v1588_v21 = vpop.xlane.xlu1 %1587 }
 0x705   : > { %3836 = vrcp.f32 %v1588_v21 }
 0x70c   : > { %v3835_v22 = vpop.eup %3834 }
 0x70d   : > { %v1594_v23 = vmul.f32 %v3835_v22, %v5047_v13 }
 0x70f   : > { %v3837_v24 = vpop.eup %3836  ;;  %v1599_v25 = vpack.c.bf16 %v1594_v23, %v1594_v23 }
 0x710   : > { %v1596_v26 = vmul.f32 %v3837_v24, %v5049_v18 }
 0x711   : > { %3553 = vmatmul.mubr.msk.bf16.vlgmr.msra.gmra.mrb[12].mxu1 %vm1354_vm2, %v1599_v25 }
 0x712   : > { %v1600_v28 = vpack.c.bf16 %v1596_v26, %v1596_v26  ;;  %3566 = vmatprep.mubr.msk.bf16.mxu1 %vm4372_vm1, %v4371_v8  ;;  %3563 = vmatpush3.bf16.msra.mxu1 %v3806_v59 }
 0x713   : > { %3564 = vmatprep.subr.bf16.mxu1 %v4371_v8 }
 0x714   : > { %3559 = vmatmul.mubr.msk.bf16.vlgmr.msra.gmra.mrb[16].mxu0 %vm1354_vm2, %v1600_v28 }
 0x715   : > { %3574 = vmatprep.mubr.msk.bf16.mxu0 %vm4372_vm1, %v4371_v8 }
 0x716   : > { %3565 = vmatpush3.bf16.msra.mxu1 %v3807_v6 }
 0x717   : > { %3578 = vmatprep.subr.bf16.mxu1 %v4371_v8 }
 0x7bf   : > { %v1642_v29 = vpop.f32.mrb[8].mxu1  ;;  %v1688_v30 = vpop.f32.mrb[12].mxu0 }
 0x7c0   : > { %v3542_v34 = vpop.f32.mrb[9].mxu1  ;;  %v3548_v35 = vpop.f32.mrb[13].mxu0 }
 0x7c1   : > { %v1645_v13 = vpop.f32.mrb[10].mxu1  ;;  %v1691_v36 = vpop.f32.mrb[14].mxu0 }
 0x7c2   : > { %v3543_v37 = vpop.f32.mrb[11].mxu1  ;;  %v3549_v38 = vpop.f32.mrb[15].mxu0  ;;  %v3426_v36 = vld [vmem:[#allocation13] ss:$0 sm:$0xff] }
 0x7e4   : > { %v1734_v18 = vpop.f32.mrb[12].mxu1 }
 0x7e5   : > { %v1786_v39 = vcombine.low %v1642_v29, %v1734_v18  ;;  %v1787_v40 = vcombine.high %v1642_v29, %v1734_v18  ;;  %v3554_v41 = vpop.f32.mrb[13].mxu1 }
 0x7e6   : > { %v1737_v43 = vpop.f32.mrb[14].mxu1 }
 0x7e7   : > { %v3555_v44 = vpop.f32.mrb[15].mxu1  ;;  %v1780_v45 = vpop.f32.mrb[16].mxu0  ;;  %v1794_v49 = vrot.slane %v1786_v39, %v4967_v42  ;;  %v1801_v50 = vrot.slane %v1787_v40, %v4967_v42 }
 0x7e8   : > { %v1802_v15 = vcombine.low %v1688_v30, %v1780_v45  ;;  %v1803_v46 = vcombine.high %v1688_v30, %v1780_v45  ;;  %v3560_v47 = vpop.f32.mrb[17].mxu0 }
 0x7e9   : > { %v1783_v48 = vpop.f32.mrb[18].mxu0 }
 0x7ea   : > { %v1810_v51 = vrot.slane %v1802_v15, %v4967_v42  ;;  %v1817_v53 = vrot.slane %v1803_v46, %v4967_v42  ;;  %v3561_v54 = vpop.f32.mrb[19].mxu0  ;;  %v3808_v48 = vld [vmem:[#allocation14] sm:$0xff]  }
 0x7eb   : > { %3571 = vmatpush3.bf16.msra.mxu0 %v3808_v48 }
 0x7ec   : > { %v1818_v55 = vcombine.low %v1794_v49, %v1810_v51  ;;  %v1819_v56 = vcombine.high %v1794_v49, %v1810_v51  ;;  %v1834_v57 = vcombine.low %v1801_v50, %v1817_v53  ;;  %v1835_v58 = vcombine.high %v1801_v50, %v1817_v53  ;;  %v3810_v49 = vld [vmem:[#allocation17] sm:$0xff]   ;;  %v3809_v50 = vld [vmem:[#allocation14 + $0x8] sm:$0xff]   ;;  %3572 = vmatprep.subr.bf16.mxu0 %v4371_v8 }
 0x7ed   : > { %v809_v51 = vld [vmem:[%s659_s14] sm:$0xff] }
 0x7ee   : > { %v1826_v60 = vrot.slane %v1818_v55, %v4978_v52  ;;  %v1833_v61 = vrot.slane %v1819_v56, %v4978_v52  ;;  %v1842_v62 = vrot.slane %v1834_v57, %v4978_v52  ;;  %v1849_v63 = vrot.slane %v1835_v58, %v4978_v52 }
 0x7ef   : > { %3573 = vmatpush3.bf16.msra.mxu0 %v3809_v50  ;;  %v2087_v53 = vpack.c.bf16 %v809_v51, %v809_v51  ;;  %v2017_v57 = vsub.s32 1, %v4918_v14 }
 0x7f0   : > { %v1854_v1 = vcombine.low %v1826_v60, %v1833_v61  ;;  %v3424_v4 = vcombine.high %v1826_v60, %v1833_v61  ;;  %v1870_v5 = vcombine.low %v1842_v62, %v1849_v63  ;;  %v3425_v27 = vcombine.high %v1842_v62, %v1849_v63  ;;  %3586 = vmatprep.subr.bf16.mxu0 %v4371_v8 }
 0x7f1   : > { %v2018_v58 = vrot.slane %v4926_v16, %v2017_v57  ;;  %v2023_v61 = vrot.slane %v4931_v17, %v2017_v57 }
 0x7f2   : > { %v1861_v7 = vrot.slane %v1854_v1, %v4967_v42  ;;  %v1869_v9 = vrot.slane %v3424_v4, %v4967_v42  ;;  %v1877_v10 = vrot.slane %v1870_v5, %v4967_v42  ;;  %v1885_v11 = vrot.slane %v3425_v27, %v4967_v42 }
 0x7f4   : > { %v1887_v19 = vcombine.high %v1861_v7, %v1869_v9  ;;  %v1903_v32 = vcombine.high %v1877_v10, %v1885_v11  ;;  %v1886_v31 = vcombine.low %v1861_v7, %v1869_v9  ;;  %v1902_v33 = vcombine.low %v1877_v10, %v1885_v11  ;;  %v3430_v7 = vld [vmem:[#allocation16] ss:$0 sm:$0xff]  ;;  %v3434_v10 = vld [vmem:[#allocation19] ss:$0 sm:$0xff] }
 0x7f6   : > { %v1901_v2 = vrot.slane %v1887_v19, %v4978_v52  ;;  %v1917_v3 = vrot.slane %v1903_v32, %v4978_v52  ;;  %v1894_v20 = vrot.slane %v1886_v31, %v4978_v52  ;;  %v1910_v21 = vrot.slane %v1902_v33, %v4978_v52 }
 0x7f8   : > { %v1920_v22 = vcombine.low %v1901_v2, %v1917_v3  ;;  %v1919_v23 = vcombine.high %v1894_v20, %v1910_v21  ;;  %v1921_v24 = vcombine.high %v1901_v2, %v1917_v3  ;;  %v1918_v25 = vcombine.low %v1894_v20, %v1910_v21 }
 0x7fa   : > { %1927 = vrot.lane.b32.xlu1 %v1920_v22, %s4380_s4  ;;  %1923 = vrot.lane.b32.xlu0 %v1919_v23, %s4381_s1 }
 0x7fe   : > { %1931 = vrot.lane.b32.xlu0 %v1921_v24, %s4382_s3 }
 0x86c   : > { %v1924_v26 = vpop.permute.xlu0 %1923  ;;  %v1928_v28 = vpop.permute.xlu1 %1927 }
 0x86d   : > { %v1934_v29 = vsel %vm1354_vm2, %v1918_v25, %v1924_v26 }
 0x86e   : > { %v1936_v34 = vsel %vm1935_vm4, %v1934_v29, %v1928_v28 }
 0x870   : > { %v1932_v30 = vpop.permute.xlu0 %1931 }
 0x871   : > { %v1938_v35 = vsel %vm1937_vm5, %v1936_v34, %v1932_v30 }
 0x872   : > { %v1939_v13 = vpack.c.bf16 %v1938_v35, %v1938_v35 }
 0x874   : > { %3567 = vmatmul.mubr.msk.bf16.vlgmr.msra.gmra.mrb[16].mxu1 %vm813_vm0, %v1939_v13 }
 0x875   : > { %3582 = vmatprep.mubr.msk.bf16.mxu1 %vm4372_vm1, %v4371_v8  ;;  %3579 = vmatpush3.bf16.msra.mxu1 %v3810_v49 }
 0x876   : > { %3580 = vmatprep.subr.bf16.mxu1 %v4371_v8 }
 0x947   : > { %v1995_v37 = vpop.f32.mrb[16].mxu1 }
 0x948   : > { %v1996_v38 = vadd.f32 %v3426_v36, %v1995_v37  ;;  %v3568_v18 = vpop.f32.mrb[17].mxu1 }
 0x949   : > { %v1998_v39 = vpop.f32.mrb[18].mxu1 }
 0x94a   : > { %v5123_v40 = vadd.f32 %v1996_v38, %v4903_v0  ;;  %v3569_v41 = vpop.f32.mrb[19].mxu1  ;;  %v3811_v0 = vld [vmem:[#allocation17 + $0x8] sm:$0xff]  }
 0x94b   : > { %3581 = vmatpush3.bf16.msra.mxu1 %v3811_v0 }
 0x94c   : > { %v2002_v43 = vsel %vm813_vm0, %v5123_v40, 0.0  ;;  %3594 = vmatprep.subr.mxu1 %v4371_v8 }
 0x94d   : > { %2003 = vadd.xlane.f32.xlu1 %v2002_v43 }
 0x94e   : > { %3583 = vmatmul.mubr.msk.bf16.vlgmr.msra.gmra.mrb[20].mxu1 %vm813_vm0, %v2087_v53 }
 0x94f   : > { %3596 = vmatprep.mubr.msk.f32.mxu1 %vm4372_vm1, %v4371_v8 }
 0x9da   : > { %v2004_v44 = vpop.xlane.xlu1 %2003 }
 0x9db   : > { %v2005_v45 = vmul.f32 0.03125, %v2004_v44 }
 0x9dd   : > { %v2006_v15 = vsub.f32 %v5123_v40, %v2005_v45 }
 0x9df   : > { %v2007_v46 = vmul.f32 %v2006_v15, %v2006_v15 }
 0x9e1   : > { %v2008_v47 = vsel %vm813_vm0, %v2007_v46, 0.0 }
 0x9e2   : > { %2009 = vadd.xlane.f32.xlu0 %v2008_v47 }
 0xa21   : > { %v2143_v4 = vpop.f32.mrb[20].mxu1 }
 0xa22   : > { %v3584_v5 = vpop.f32.mrb[21].mxu1  ;;  %v2144_v32 = vadd.f32 %v3434_v10, %v2143_v4 }
 0xa23   : > { %v2146_v27 = vpop.f32.mrb[22].mxu1 }
 0xa24   : > { %v3585_v6 = vpop.f32.mrb[23].mxu1 }
 0xa6f   : > { %v2010_v54 = vpop.xlane.xlu0 %2009 }
 0xa70   : > { %v2011_v55 = vmul.f32 0.03125, %v2010_v54 }
 0xa72   : > { %v2012_v56 = vadd.f32 1e-06, %v2011_v55 }
 0xa74   : > { %3838 = vrsqrt.f32 %v2012_v56 }
 0xa7e   : > { %v3839_v59 = vpop.eup %3838 }
 0xa7f   : > { %v2014_v60 = vmul.f32 %v3839_v59, %v2006_v15 }
 0xa81   : > { %v2019_v62 = vmul.f32 %v2018_v58, %v2014_v60 }
 0xa83   : > { %v2024_v63 = vadd.f32 %v2023_v61, %v2019_v62 }
 0xa85   : > { %v2025_v1 = vpack.c.bf16 %v2024_v63, %v2024_v63 }
 0xa87   : > { %3575 = vmatmul.mubr.msk.bf16.vlgmr.msra.gmra.mrb[20].mxu0 %vm813_vm0, %v2025_v1 }
 0xa88   : > { %3590 = vmatprep.mubr.msk.bf16.mxu0 %vm4372_vm1, %v4371_v8 }
 0xb5a   : > { %v2081_v9 = vpop.f32.mrb[20].mxu0 }
 0xb5b   : > { %v2082_v16 = vadd.f32 %v3430_v7, %v2081_v9  ;;  %v3576_v11 = vpop.f32.mrb[21].mxu0 }
 0xb5c   : > { %v2084_v19 = vpop.f32.mrb[22].mxu0 }
 0xb5d   : > { %2153 = vrot.lane.b32.xlu1 %v2082_v16, %s4375_s16  ;;  %2150 = vrot.lane.b32.xlu0 %v2082_v16, %s4374_s22  ;;  %v3577_v17 = vpop.f32.mrb[23].mxu0 }
 0xb61   : > { %2156 = vrot.lane.b32.xlu1 %v2082_v16, %s4373_s5  ;;  %2308 = vrot.lane.b32.xlu0 %v2144_v32, %s4374_s22 }
 0xb65   : > { %2227 = vrot.lane.b32.xlu0 %v2082_v16, %s4376_s20 }
 0xbcf   : > { %v2154_v31 = vpop.permute.xlu1 %2153  ;;  %v2151_v33 = vpop.permute.xlu0 %2150 }
 0xbd0   : > { %2231 = vrot.lane.b32.xlu0 %v2154_v31, %s4376_s20  ;;  %2229 = vrot.lane.b32.xlu1 %v2151_v33, %s4376_s20  ;;  %v2159_v2 = vcombine.low %v2082_v16, %v2154_v31  ;;  %v2160_v3 = vcombine.high %v2082_v16, %v2154_v31 }
 0xbd2   : > { %v2167_v23 = vrot.slane %v2159_v2, %v4967_v42  ;;  %v5155_v24 = vrot.slane %v2160_v3, %v4967_v42 }
 0xbd3   : > { %v2157_v20 = vpop.permute.xlu1 %2156  ;;  %v2309_v35 = vpop.permute.xlu0 %2308 }
 0xbd4   : > { %v2175_v21 = vcombine.low %v2151_v33, %v2157_v20  ;;  %v2176_v22 = vcombine.high %v2151_v33, %v2157_v20  ;;  %2314 = vrot.lane.b32.xlu0 %v2144_v32, %s4373_s5  ;;  %2233 = vrot.lane.b32.xlu1 %v2157_v20, %s4376_s20 }
 0xbd6   : > { %v2183_v25 = vrot.slane %v2175_v21, %v4967_v42  ;;  %v5159_v26 = vrot.slane %v2176_v22, %v4967_v42 }
 0xbd7   : > { %v2228_v13 = vpop.permute.xlu0 %2227 }
 0xbd8   : > { %v2191_v28 = vcombine.low %v2167_v23, %v2183_v25  ;;  %v2192_v29 = vcombine.high %v2167_v23, %v2183_v25  ;;  %v2207_v30 = vcombine.low %v5155_v24, %v5159_v26  ;;  %v2208_v34 = vcombine.high %v5155_v24, %v5159_v26  ;;  %2311 = vrot.lane.b32.xlu1 %v2144_v32, %s4375_s16  ;;  %s5535_s16 = sld [smem:[#allocation50_spill]] }
 0xbda   : > { %v2199_v0 = vrot.slane %v2191_v28, %v4978_v52  ;;  %v2206_v56 = vrot.slane %v2192_v29, %v4978_v52  ;;  %v2215_v7 = vrot.slane %v2207_v30, %v4978_v52 }
 0xbdc   : > { %v2223_v62 = vcombine.high %v2199_v0, %v4371_v8  ;;  %v2224_v6 = vcombine.high %v2206_v56, %v4371_v8  ;;  %v2225_v2 = vcombine.high %v2215_v7, %v4371_v8 }
 0xbde   : > { %s5384_s20 = scalar_lea.hbm %s5535_s16, %s3457_s26 }
 0xc42   : > { %v2230_v36 = vpop.permute.xlu1 %2229  ;;  %v2232_v37 = vpop.permute.xlu0 %2231 }
 0xc43   : > { %v2239_v50 = vcombine.low %v2228_v13, %v2232_v37  ;;  %v2240_v60 = vcombine.high %v2228_v13, %v2232_v37 }
 0xc45   : > { %v2247_v61 = vrot.slane %v2239_v50, %v4967_v42  ;;  %v2254_v19 = vrot.slane %v2240_v60, %v4967_v42 }
 0xc46   : > { %v2234_v38 = vpop.permute.xlu1 %2233  ;;  %v2315_v18 = vpop.permute.xlu0 %2314 }
 0xc47   : > { %v2333_v39 = vcombine.low %v2309_v35, %v2315_v18  ;;  %v2334_v41 = vcombine.high %v2309_v35, %v2315_v18  ;;  %v2255_v15 = vcombine.low %v2230_v36, %v2234_v38  ;;  %v2256_v55 = vcombine.high %v2230_v36, %v2234_v38 }
 0xc49   : > { %v2341_v46 = vrot.slane %v2333_v39, %v4967_v42  ;;  %v5168_v47 = vrot.slane %v2334_v41, %v4967_v42  ;;  %v2263_v57 = vrot.slane %v2255_v15, %v4967_v42  ;;  %v2270_v27 = vrot.slane %v2256_v55, %v4967_v42 }
 0xc4a   : > { %v2312_v43 = vpop.permute.xlu1 %2311 }
 0xc4b   : > { %v2317_v44 = vcombine.low %v2144_v32, %v2312_v43  ;;  %v2318_v45 = vcombine.high %v2144_v32, %v2312_v43  ;;  %v2272_v9 = vcombine.high %v2247_v61, %v2263_v57  ;;  %v2271_v17 = vcombine.low %v2247_v61, %v2263_v57 }
 0xc4c   : > { %v2287_v3 = vcombine.low %v2254_v19, %v2270_v27  ;;  %v2288_v29 = vcombine.high %v2254_v19, %v2270_v27  ;;  %v2222_v43 = vrot.slane %v2208_v34, %v4978_v52 }
 0xc4d   : > { %v2325_v48 = vrot.slane %v2317_v44, %v4967_v42  ;;  %v5172_v49 = vrot.slane %v2318_v45, %v4967_v42  ;;  %v5216_v22 = vrot.slane %v2272_v9, %v4978_v52  ;;  %v5221_v28 = vrot.slane %v2271_v17, %v4978_v52 }
 0xc4e   : > { %v5226_v13 = vrot.slane %v2287_v3, %v4978_v52  ;;  %v5237_v41 = vrot.slane %v2288_v29, %v4978_v52 }
 0xc4f   : > { %v2349_v51 = vcombine.low %v2325_v48, %v2341_v46  ;;  %v2350_v53 = vcombine.high %v2325_v48, %v2341_v46  ;;  %v2365_v54 = vcombine.low %v5172_v49, %v5168_v47  ;;  %v2387_v35 = vmul.f32 %v5216_v22, %v2206_v56 }
 0xc50   : > { %v2385_v37 = vmul.f32 %v5221_v28, %v2199_v0  ;;  %v5232_v38 = vcombine.high %v5216_v22, %v4371_v8  ;;  %v2389_v39 = vmul.f32 %v5226_v13, %v2215_v7  ;;  %v2366_v44 = vcombine.high %v5172_v49, %v5168_v47 }
 0xc51   : > { %v5180_v58 = vrot.slane %v2349_v51, %v4978_v52  ;;  %v5183_v59 = vrot.slane %v2350_v53, %v4978_v52  ;;  %v5197_v5 = vrot.slane %v2365_v54, %v4978_v52  ;;  %v2400_v18 = vsel %vm2393_vm6, %v2387_v35, 0.0 }
 0xc52   : > { %v2394_v45 = vsel %vm2393_vm6, %v2385_v37, 0.0  ;;  %v2388_v15 = vmul.f32 %v5232_v38, %v2224_v6  ;;  %v5249_v46 = vcombine.high %v5226_v13, %v4371_v8  ;;  %v2406_v48 = vsel %vm2393_vm6, %v2389_v39, 0.0 }
 0xc53   : > { %v2426_v63 = vmul.f32 %v5180_v58, %v2199_v0  ;;  %v5190_v1 = vcombine.high %v5180_v58, %v4371_v8  ;;  %v5194_v4 = vcombine.high %v5183_v59, %v4371_v8  ;;  %v2428_v11 = vmul.f32 %v5183_v59, %v2206_v56 }
 0xc54   : > { %v5210_v33 = vcombine.high %v5197_v5, %v4371_v8  ;;  %v2430_v21 = vmul.f32 %v5197_v5, %v2215_v7  ;;  %v2391_v50 = vmul.f32 %v5237_v41, %v2222_v43  ;;  %v5255_v24 = vcombine.high %v5221_v28, %v4371_v8 }
 0xc55   : > { %v2434_v10 = vsel %vm2393_vm6, %v2426_v63, 0.0  ;;  %v2427_v16 = vmul.f32 %v5190_v1, %v2223_v62  ;;  %v2429_v31 = vmul.f32 %v5194_v4, %v2224_v6  ;;  %v2440_v20 = vsel %vm2393_vm6, %v2428_v11, 0.0 }
 0xc56   : > { %2435 = vadd.xlane.f32.xlu0 %v2434_v10  ;;  %v2431_v25 = vmul.f32 %v5210_v33, %v2225_v2  ;;  %v2446_v30 = vsel %vm2393_vm6, %v2430_v21, 0.0  ;;  %v2403_v26 = vsel %vm2393_vm6, %v2388_v15, 0.0  ;;  %v2390_v34 = vmul.f32 %v5249_v46, %v2225_v2 }
 0xc57   : > { %v2437_v32 = vsel %vm2393_vm6, %v2427_v16, 0.0  ;;  %v2443_v23 = vsel %vm2393_vm6, %v2429_v31, 0.0  ;;  %v5261_v47 = vcombine.high %v5237_v41, %v4371_v8  ;;  %v5264_v49 = vrot.slane %v2366_v44, %v4978_v52 }
 0xc58   : > { %2438 = vadd.xlane.f32.xlu1 %v2437_v32  ;;  %v2449_v36 = vsel %vm2393_vm6, %v2431_v25, 0.0  ;;  %v2412_v0 = vsel %vm2393_vm6, %v2391_v50, 0.0  ;;  %v2386_v51 = vmul.f32 %v5255_v24, %v2223_v62  ;;  %v2226_v53 = vcombine.high %v2222_v43, %v4371_v8 }
 0xc59   : > { %v2409_v54 = vsel %vm2393_vm6, %v2390_v34, 0.0  ;;  %v5273_v56 = vcombine.high %v5264_v49, %v4371_v8  ;;  %v2432_v60 = vmul.f32 %v5264_v49, %v2222_v43 }
 0xc5a   : > { %2441 = vadd.xlane.f32.xlu0 %v2440_v20  ;;  %v2392_v55 = vmul.f32 %v5261_v47, %v2226_v53  ;;  %v2397_v57 = vsel %vm2393_vm6, %v2386_v51, 0.0 }
 0xc5b   : > { %v2433_v62 = vmul.f32 %v5273_v56, %v2226_v53  ;;  %v2452_v63 = vsel %vm2393_vm6, %v2432_v60, 0.0 }
 0xc5c   : > { %2444 = vadd.xlane.f32.xlu1 %v2443_v23  ;;  %v2415_v61 = vsel %vm2393_vm6, %v2392_v55, 0.0 }
 0xc5d   : > { %v2455_v27 = vsel %vm2393_vm6, %v2433_v62, 0.0 }
 0xc5e   : > { %2447 = vadd.xlane.f32.xlu0 %v2446_v30 }
 0xc60   : > { %2450 = vadd.xlane.f32.xlu1 %v2449_v36 }
 0xc62   : > { %2401 = vadd.xlane.f32.xlu0 %v2400_v18 }
 0xc64   : > { %2395 = vadd.xlane.f32.xlu1 %v2394_v45 }
 0xc66   : > { %2407 = vadd.xlane.f32.xlu0 %v2406_v48 }
 0xc68   : > { %2404 = vadd.xlane.f32.xlu1 %v2403_v26 }
 0xc6a   : > { %2413 = vadd.xlane.f32.xlu0 %v2412_v0 }
 0xc6c   : > { %2410 = vadd.xlane.f32.xlu1 %v2409_v54 }
 0xc6e   : > { %2398 = vadd.xlane.f32.xlu0 %v2397_v57 }
 0xc70   : > { %2416 = vadd.xlane.f32.xlu1 %v2415_v61 }
 0xc72   : > { %2453 = vadd.xlane.f32.xlu0 %v2452_v63 }
 0xc74   : > { %2456 = vadd.xlane.f32.xlu1 %v2455_v27 }
 0xce3   : > { %v2436_v6 = vpop.xlane.xlu0 %2435 }
 0xce4   : > { %v2458_v2 = vmul.f32 0.35355338, %v2436_v6 }
 0xce5   : > { %v2439_v7 = vpop.xlane.xlu1 %2438 }
 0xce6   : > { %v2459_v27 = vmul.f32 0.35355338, %v2439_v7 }
 0xce7   : > { %v2442_v9 = vpop.xlane.xlu0 %2441 }
 0xce8   : > { %v2460_v17 = vmul.f32 0.35355338, %v2442_v9 }
 0xce9   : > { %v2445_v10 = vpop.xlane.xlu1 %2444 }
 0xcea   : > { %v2461_v36 = vmul.f32 0.35355338, %v2445_v10 }
 0xceb   : > { %v2448_v16 = vpop.xlane.xlu0 %2447 }
 0xcec   : > { %v2462_v29 = vmul.f32 0.35355338, %v2448_v16 }
 0xced   : > { %v2451_v11 = vpop.xlane.xlu1 %2450 }
 0xcee   : > { %v2463_v26 = vmul.f32 0.35355338, %v2451_v11 }
 0xcef   : > { %v2402_v19 = vpop.xlane.xlu0 %2401 }
 0xcf0   : > { %v2420_v32 = vmul.f32 0.35355338, %v2402_v19 }
 0xcf1   : > { %v2396_v31 = vpop.xlane.xlu1 %2395 }
 0xcf2   : > { %v2468_v3 = vmax.f32 %v2420_v32, %v2460_v17  ;;  %v2418_v20 = vmul.f32 0.35355338, %v2396_v31 }
 0xcf3   : > { %v2408_v21 = vpop.xlane.xlu0 %2407 }
 0xcf4   : > { %v2466_v23 = vmax.f32 %v2418_v20, %v2458_v2  ;;  %v2422_v25 = vmul.f32 0.35355338, %v2408_v21  ;;  %v2476_v30 = vsub.f32 %v2420_v32, %v2468_v3  ;;  %v2500_v37 = vsub.f32 %v2460_v17, %v2468_v3 }
 0xcf5   : > { %v2405_v35 = vpop.xlane.xlu1 %2404 }
 0xcf6   : > { %v2474_v18 = vsub.f32 %v2418_v20, %v2466_v23  ;;  %v2498_v39 = vsub.f32 %v2458_v2, %v2466_v23  ;;  %v2470_v43 = vmax.f32 %v2422_v25, %v2462_v29  ;;  %v2421_v44 = vmul.f32 0.35355338, %v2405_v35 }
 0xcf7   : > { %v2414_v45 = vpop.xlane.xlu0 %2413  ;;  %v2486_v15 = vmul.f32 1.442695, %v2476_v30  ;;  %v2510_v34 = vmul.f32 1.442695, %v2500_v37 }
 0xcf8   : > { %v2469_v48 = vmax.f32 %v2421_v44, %v2461_v36  ;;  %v2482_v51 = vmul.f32 1.442695, %v2474_v18  ;;  %v2506_v53 = vmul.f32 1.442695, %v2498_v39  ;;  %v2478_v54 = vsub.f32 %v2422_v25, %v2470_v43 }
 0xcf9   : > { %v2411_v50 = vpop.xlane.xlu1 %2410  ;;  %v2502_v60 = vsub.f32 %v2462_v29, %v2470_v43  ;;  %3840 = vpow2.f32 %v2486_v15  ;;  %v2424_v19 = vmul.f32 0.35355338, %v2414_v45 }
 0xcfa   : > { %v2423_v0 = vmul.f32 0.35355338, %v2411_v50  ;;  %v2477_v55 = vsub.f32 %v2421_v44, %v2469_v48  ;;  %v2501_v61 = vsub.f32 %v2461_v36, %v2469_v48  ;;  %3842 = vpow2.f32 %v2510_v34 }
 0xcfb   : > { %v2399_v57 = vpop.xlane.xlu0 %2398  ;;  %3844 = vpow2.f32 %v2482_v51  ;;  %v2490_v11 = vmul.f32 1.442695, %v2478_v54  ;;  %v2514_v31 = vmul.f32 1.442695, %v2502_v60 }
 0xcfc   : > { %v2471_v62 = vmax.f32 %v2423_v0, %v2463_v26  ;;  %v2419_v63 = vmul.f32 0.35355338, %v2399_v57  ;;  %v2488_v6 = vmul.f32 1.442695, %v2477_v55  ;;  %v2512_v10 = vmul.f32 1.442695, %v2501_v61 }
 0xcfd   : > { %v2417_v9 = vpop.xlane.xlu1 %2416  ;;  %3846 = vpow2.f32 %v2506_v53 }
 0xcfe   : > { %v2479_v16 = vsub.f32 %v2423_v0, %v2471_v62  ;;  %v2467_v17 = vmax.f32 %v2419_v63, %v2459_v27  ;;  %v2503_v2 = vsub.f32 %v2463_v26, %v2471_v62  ;;  %3848 = vpow2.f32 %v2488_v6 }
 0xcff   : > { %v2454_v32 = vpop.xlane.xlu0 %2453  ;;  %3850 = vpow2.f32 %v2512_v10  ;;  %v2425_v36 = vmul.f32 0.35355338, %v2417_v9 }
 0xd00   : > { %v2464_v3 = vmul.f32 0.35355338, %v2454_v32  ;;  %v2475_v20 = vsub.f32 %v2419_v63, %v2467_v17  ;;  %v2499_v21 = vsub.f32 %v2459_v27, %v2467_v17  ;;  %v2492_v7 = vmul.f32 1.442695, %v2479_v16 }
 0xd01   : > { %v2457_v23 = vpop.xlane.xlu1 %2456  ;;  %3852 = vpow2.f32 %v2490_v11  ;;  %v2516_v37 = vmul.f32 1.442695, %v2503_v2 }
 0xd02   : > { %v2472_v25 = vmax.f32 %v2424_v19, %v2464_v3  ;;  %v2465_v29 = vmul.f32 0.35355338, %v2457_v23  ;;  %v2484_v30 = vmul.f32 1.442695, %v2475_v20  ;;  %v2508_v35 = vmul.f32 1.442695, %v2499_v21 }
 0xd03   : > { %3854 = vpow2.f32 %v2514_v31  ;;  %v3841_v45 = vpop.eup %3840 }
 0xd04   : > { %v2480_v18 = vsub.f32 %v2424_v19, %v2472_v25  ;;  %v2504_v39 = vsub.f32 %v2464_v3, %v2472_v25  ;;  %3856 = vpow2.f32 %v2484_v30  ;;  %v2473_v43 = vmax.f32 %v2425_v36, %v2465_v29  ;;  %v3843_v26 = vpop.eup %3842 }
 0xd05   : > { %3858 = vpow2.f32 %v2492_v7  ;;  %v3845_v34 = vpop.eup %3844  ;;  %v2548_v9 = vadd.f32 %v3843_v26, %v3841_v45  ;;  %v2532_v30 = vmul.f32 %v3843_v26, %v5183_v59 }
 0xd06   : > { %v2494_v44 = vmul.f32 1.442695, %v2480_v18  ;;  %3860 = vpow2.f32 %v2508_v35  ;;  %v2518_v15 = vmul.f32 1.442695, %v2504_v39  ;;  %v2481_v48 = vsub.f32 %v2425_v36, %v2473_v43 }
 0xd07   : > { %v2505_v50 = vsub.f32 %v2465_v29, %v2473_v43  ;;  %3862 = vpow2.f32 %v2516_v37  ;;  %v3847_v51 = vpop.eup %3846  ;;  %v2522_v20 = vmul.f32 %v3845_v34, %v5221_v28  ;;  %v2524_v29 = vmul.f32 %v3841_v45, %v5216_v22 }
 0xd08   : > { %3864 = vpow2.f32 %v2494_v44  ;;  %v2496_v0 = vmul.f32 1.442695, %v2481_v48  ;;  %v3849_v54 = vpop.eup %3848  ;;  %v2546_v61 = vadd.f32 %v3847_v51, %v3845_v34  ;;  %v2530_v21 = vmul.f32 %v3847_v51, %v5180_v58 }
 0xd09   : > { %3866 = vpow2.f32 %v2518_v15  ;;  %v2520_v53 = vmul.f32 1.442695, %v2505_v50  ;;  %v3851_v55 = vpop.eup %3850  ;;  %v2525_v35 = vmul.f32 %v3849_v54, %v5232_v38  ;;  %v2540_v44 = vadd.f32 %v2532_v30, %v2524_v29 }
 0xd0a   : > { %3868 = vpow2.f32 %v2496_v0  ;;  %v2549_v63 = vadd.f32 %v3851_v55, %v3849_v54  ;;  %v2533_v36 = vmul.f32 %v3851_v55, %v5194_v4  ;;  %v2538_v39 = vadd.f32 %v2530_v21, %v2522_v20 }
 0xd0b   : > { %v3853_v57 = vpop.eup %3852  ;;  %3870 = vpow2.f32 %v2520_v53 }
 0xd0c   : > { %3872 = vrcp.f32 %v2546_v61  ;;  %v2541_v59 = vadd.f32 %v2533_v36, %v2525_v35  ;;  %v3812_v61 = vld [vmem:[#allocation20] sm:$0xff]  }
 0xd0d   : > { %v3855_v60 = vpop.eup %3854  ;;  %3874 = vrcp.f32 %v2549_v63  ;;  %3587 = vmatpush3.bf16.msra.mxu0 %v3812_v61  ;;  %v3817_v61 = vld [vmem:[%s5533_s2 + $0x8] sm:$0xff]  }
 0xd0e   : > { %v3857_v62 = vpop.eup %3856  ;;  %v2550_v16 = vadd.f32 %v3855_v60, %v3853_v57  ;;  %v2534_v22 = vmul.f32 %v3855_v60, %v5197_v5  ;;  %3588 = vmatprep.subr.bf16.mxu0 %v4371_v8 }
 0xd0f   : > { %v3859_v27 = vpop.eup %3858  ;;  %v2523_v23 = vmul.f32 %v3857_v62, %v5255_v24 }
 0xd10   : > { %v3861_v6 = vpop.eup %3860  ;;  %v2527_v38 = vmul.f32 %v3859_v27, %v5249_v46 }
 0xd11   : > { %v3863_v10 = vpop.eup %3862  ;;  %v2547_v11 = vadd.f32 %v3861_v6, %v3857_v62  ;;  %v2531_v7 = vmul.f32 %v3861_v6, %v5190_v1  ;;  %v2526_v1 = vmul.f32 %v3853_v57, %v5226_v13 }
 0xd12   : > { %v3865_v19 = vpop.eup %3864  ;;  %v2551_v32 = vadd.f32 %v3863_v10, %v3859_v27  ;;  %v2535_v4 = vmul.f32 %v3863_v10, %v5210_v33 }
 0xd13   : > { %v3867_v17 = vpop.eup %3866  ;;  %3876 = vrcp.f32 %v2547_v11  ;;  %v2528_v28 = vmul.f32 %v3865_v19, %v5237_v41  ;;  %v2539_v24 = vadd.f32 %v2531_v7, %v2523_v23  ;;  %v2542_v13 = vadd.f32 %v2534_v22, %v2526_v1 }
 0xd14   : > { %3878 = vrcp.f32 %v2548_v9  ;;  %v2552_v31 = vadd.f32 %v3867_v17, %v3865_v19  ;;  %v3869_v2 = vpop.eup %3868  ;;  %v2536_v58 = vmul.f32 %v3867_v17, %v5264_v49  ;;  %v2543_v55 = vadd.f32 %v2535_v4, %v2527_v38  ;;  %v3813_v9 = vld [vmem:[#allocation20 + $0x8] sm:$0xff]  }
 0xd15   : > { %3880 = vrcp.f32 %v2550_v16  ;;  %v3871_v3 = vpop.eup %3870  ;;  %v2529_v49 = vmul.f32 %v3869_v2, %v5261_v47  ;;  %3589 = vmatpush3.bf16.msra.mxu0 %v3813_v9 }
 0xd16   : > { %3882 = vrcp.f32 %v2552_v31  ;;  %v2553_v25 = vadd.f32 %v3871_v3, %v3869_v2  ;;  %v3873_v37 = vpop.eup %3872  ;;  %v2537_v50 = vmul.f32 %v3871_v3, %v5273_v56  ;;  %v2544_v26 = vadd.f32 %v2536_v58, %v2528_v28  ;;  %3604 = vmatprep.subr.mxu0 %v4371_v8  ;;  %v3438_v28 = vld [vmem:[#allocation22] ss:$0 sm:$0xff] }
 0xd17   : > { %3884 = vrcp.f32 %v2551_v32  ;;  %v3875_v18 = vpop.eup %3874  ;;  %v2555_v15 = vmul.f32 %v3873_v37, %v2538_v39 }
 0xd18   : > { %3886 = vrcp.f32 %v2553_v25  ;;  %v2561_v34 = vmul.f32 %v3875_v18, %v2541_v59  ;;  %v2545_v57 = vadd.f32 %v2537_v50, %v2529_v49  ;;  %v2731_v49 = vsub.s32 2, %v4918_v14 }
 0xd1d   : > { %v3877_v43 = vpop.eup %3876 }
 0xd1e   : > { %v3879_v45 = vpop.eup %3878  ;;  %v2557_v48 = vmul.f32 %v3877_v43, %v2539_v24 }
 0xd1f   : > { %v3881_v41 = vpop.eup %3880  ;;  %v2559_v51 = vmul.f32 %v3879_v45, %v2540_v44 }
 0xd20   : > { %v3883_v0 = vpop.eup %3882  ;;  %v2578_v53 = vcombine.low %v2557_v48, %v2561_v34  ;;  %v2563_v46 = vmul.f32 %v3881_v41, %v2542_v13 }
 0xd21   : > { %v2567_v5 = vmul.f32 %v3883_v0, %v2544_v26  ;;  %v3885_v54 = vpop.eup %3884  ;;  %v2570_v60 = vcombine.low %v2555_v15, %v2559_v51  ;;  %v3890_v26 = vld [vmem:[%s5531_s9] sm:$0xf] }
 0xd22   : > { %v3887_v33 = vpop.eup %3886  ;;  %v2565_v62 = vmul.f32 %v3885_v54, %v2543_v55  ;;  %v2585_v47 = vrot.slane %v2578_v53, %v4967_v42  ;;  %v2732_v34 = vrot.slane %v3890_v26, %v2731_v49  ;;  %v3893_v54 = vld [vmem:[%s667_s30] ss:$0 sm:$0xff]  ;;  %s3168_s30 = sshll.u32 %s766_s18, 4  ;;  %s5386_s30 = int_to_ptr.vmem [resolvable:$true] %s3168_s30 }
 0xd23   : > { %v2569_v63 = vmul.f32 %v3887_v33, %v2545_v57  ;;  %v2586_v27 = vcombine.low %v2563_v46, %v2567_v5  ;;  %v2577_v56 = vrot.slane %v2570_v60, %v4967_v42  ;;  %v3891_v5 = vld [vmem:[%s5532_s21] sm:$0xf]  ;;  %s4264_s0 = scalar_lea.vmem %s5386_s30, 128 }
 0xd24   : > { %v2737_v53 = vrot.slane %v3891_v5, %v2731_v49  ;;  %v3815_v60 = vld [vmem:[%s5533_s2] sm:$0xff]   ;;  %p4265_p10 = scmp.ne.s32.totalorder %s5386_s30, %s4264_s0 }
 0xd25   : > { %v2594_v6 = vcombine.low %v2565_v62, %v2569_v63  ;;  %v2593_v10 = vrot.slane %v2586_v27, %v4967_v42  ;;  %v2603_v11 = vcombine.high %v2577_v56, %v2585_v47  ;;  %v2602_v19 = vcombine.low %v2577_v56, %v2585_v47  ;;  %v3816_v62 = vld [vmem:[%s5533_s2 + $0x18] sm:$0xff]  }
 0xd26   : > { %p4266_p2 = pnand %p4265_p10, %p5536_p11 }
 0xd27   : > { %v2601_v16 = vrot.slane %v2594_v6, %v4967_v42  ;;  %v2617_v31 = vrot.slane %v2603_v11, %v4978_v52  ;;  %v2610_v3 = vrot.slane %v2602_v19, %v4978_v52  ;;  %v3819_v19 = vld [vmem:[%s5533_s2 + $0x28] sm:$0xff]  }
 0xd28   : > { %p4267_p13 = pneg %p4266_p2 }
 0xd29   : > { %v2619_v17 = vcombine.high %v2593_v10, %v2601_v16  ;;  %v2618_v32 = vcombine.low %v2593_v10, %v2601_v16  ;;  %v3818_v10 = vld [vmem:[%s5533_s2 + $0x20] sm:$0xff]  }
 0xd2b   : > { %v2633_v2 = vrot.slane %v2619_v17, %v4978_v52  ;;  %v2626_v20 = vrot.slane %v2618_v32, %v4978_v52 }
 0xd2d   : > { %v2636_v21 = vcombine.low %v2617_v31, %v2633_v2  ;;  %v2635_v23 = vcombine.high %v2610_v3, %v2626_v20  ;;  %v2634_v7 = vcombine.low %v2610_v3, %v2626_v20  ;;  %v2637_v42 = vcombine.high %v2617_v31, %v2633_v2 }
 0xd2f   : > { %2643 = vrot.lane.b32.xlu1 %v2636_v21, %s4380_s4  ;;  %2639 = vrot.lane.b32.xlu0 %v2635_v23, %s4381_s1  ;;  %s4268_s4 = sshll.u32 %s4383_s11, 4  ;;  %s4269_s4 = int_to_ptr.vmem [resolvable:$false] %s4268_s4 }
 0xd30   : > { %s4270_s1 = scalar_lea.vmem %s4269_s4, 256  ;;  %p4271_p12 = scmp.lt.s32.totalorder %s5386_s30, %s4269_s4 }
 0xd31   : > { %p4272_p1 = scmp.lt.s32.totalorder %s4270_s1, %s4264_s0 }
 0xd33   : > { %2647 = vrot.lane.b32.xlu1 %v2637_v42, %s4382_s3  ;;  %p4273_p0 = por %p4272_p1, %p4271_p12 }
 0xd35   : > { %p4274_p5 = pnand %p4273_p0, %p4267_p13 }
 0xda1   : > { %v2644_v25 = vpop.permute.xlu1 %2643  ;;  %v2640_v29 = vpop.permute.xlu0 %2639 }
 0xda2   : > { %v2650_v30 = vsel %vm1354_vm2, %v2634_v7, %v2640_v29 }
 0xda3   : > { %v2651_v36 = vsel %vm1935_vm4, %v2650_v30, %v2644_v25 }
 0xda5   : > { %v2648_v35 = vpop.permute.xlu1 %2647 }
 0xda6   : > { %v2652_v37 = vsel %vm1937_vm5, %v2651_v36, %v2648_v35 }
 0xda7   : > { %v2653_v52 = vpack.c.bf16 %v2652_v37, %v2652_v37 }
 0xda9   : > { %3591 = vmatmul.mubr.msk.bf16.vlgmr.msra.gmra.mrb[24].mxu0 %vm813_vm0, %v2653_v52 }
 0xdaa   : > { %3606 = vmatprep.mubr.msk.f32.mxu0 %vm4372_vm1, %v4371_v8 }
 0xe7c   : > { %v2709_v58 = vpop.f32.mrb[24].mxu0 }
 0xe7d   : > { %v2710_v18 = vadd.f32 %v3438_v28, %v2709_v58  ;;  %v3592_v39 = vpop.f32.mrb[25].mxu0 }
 0xe7e   : > { %v2712_v24 = vpop.f32.mrb[26].mxu0 }
 0xe7f   : > { %v5317_v43 = vadd.f32 %v2710_v18, %v5123_v40  ;;  %v3593_v1 = vpop.f32.mrb[27].mxu0  ;;  %v2742_v40 = vand.u32 127, %v828_v12 }
 0xe81   : > { %v2716_v22 = vsel %vm813_vm0, %v5317_v43, 0.0  ;;  %v2749_v50 = vadd.s32 1, %v2742_v40  ;;  %v3442_v13 = vadd.s32 4294967295, %v2742_v40  ;;  %vm2752_vm9 = vcmp.eq.s32.totalorder %v4918_v14, %v2742_v40 }
 0xe82   : > { %2717 = vadd.xlane.f32.xlu0 %v2716_v22  ;;  %v2753_v33 = vsel %vm2752_vm9, %v3893_v54, 0.0 }
 0xe83   : > { %vm2750_vm7 = vcmp.eq.s32.totalorder %v4918_v14, %v2749_v50  ;;  %vm2755_vm8 = vcmp.eq.s32.totalorder %v4918_v14, %v3442_v13  ;;  %v3814_v14 = vld [vmem:[%s5533_s2 + $0x10] sm:$0xff]  }
 0xe84   : > { %v2751_v57 = vsel %vm2750_vm7, %v3893_v54, 0.0  ;;  %v2756_v46 = vsel %vm2755_vm8, %v3893_v54, 0.0 }
 0xf0f   : > { %v2718_v44 = vpop.xlane.xlu0 %2717 }
 0xf10   : > { %v2719_v59 = vmul.f32 0.03125, %v2718_v44 }
 0xf12   : > { %v2720_v45 = vsub.f32 %v5317_v43, %v2719_v59 }
 0xf14   : > { %v2721_v38 = vmul.f32 %v2720_v45, %v2720_v45 }
 0xf16   : > { %v2722_v4 = vsel %vm813_vm0, %v2721_v38, 0.0 }
 0xf17   : > { %2723 = vadd.xlane.f32.xlu1 %v2722_v4 }
 0xfa4   : > { %v2724_v15 = vpop.xlane.xlu1 %2723 }
 0xfa5   : > { %v2725_v48 = vmul.f32 0.03125, %v2724_v15 }
 0xfa7   : > { %v2726_v41 = vadd.f32 1e-06, %v2725_v48 }
 0xfa9   : > { %3888 = vrsqrt.f32 %v2726_v41 }
 0xfb3   : > { %v3889_v0 = vpop.eup %3888 }
 0xfb4   : > { %v2728_v51 = vmul.f32 %v3889_v0, %v2720_v45 }
 0xfb6   : > { %v2733_v12 = vmul.f32 %v2732_v34, %v2728_v51 }
 0xfb8   : > { %v2738_v55 = vadd.f32 %v2737_v53, %v2733_v12 }
 0xfba   : > { %3595 = vmatpush3.msra.mxu1 %v2738_v55  ;;  %3605 = vmatpush3.msra.mxu0 %v2738_v55 }
 0xfbb   : > { %3597 = vmatmul.mubr.msk.f32.vlgmr.msra.gmra.mrb[24].mxu1 %vm1354_vm2, %v2751_v57  ;;  %3599 = vmatprep.subr.mxu1 %v4371_v8 }
 0xfbc   : > { %3600 = vmatpush3.msra.mxu1 %v2738_v55  ;;  %3601 = vmatprep.mubr.msk.f32.mxu1 %vm4372_vm1, %v4371_v8 }
 0xfbd   : > { %3607 = vmatmul.mubr.msk.f32.vlgmr.msra.gmra.mrb[28].mxu0 %vm1354_vm2, %v2756_v46  ;;  %3609 = vmatprep.subr.bf16.mxu1 %v4371_v8 }
 0xfbe   : > { %3617 = vmatprep.subr.bf16.mxu0 %v4371_v8  ;;  %3621 = vmatprep.mubr.msk.bf16.mxu0 %vm4372_vm1, %v4371_v8 }
 0xfbf   : > { %3602 = vmatmul.mubr.msk.f32.vlgmr.msra.gmra.mrb[26].mxu1 %vm1354_vm2, %v2753_v33  ;;  %3618 = vmatpush3.bf16.msra.mxu0 %v3815_v60 }
 0xfc0   : > { %3610 = vmatpush3.bf16.msra.mxu1 %v3814_v14  ;;  %3619 = vmatprep.subr.bf16.mxu0 %v4371_v8 }
 0xfc1   : > { %3611 = vmatprep.subr.bf16.mxu1 %v4371_v8  ;;  %3613 = vmatprep.mubr.msk.bf16.mxu1 %vm4372_vm1, %v4371_v8 }
 0xfc3   : > { %3620 = vmatpush3.bf16.msra.mxu0 %v3817_v61 }
 0xfc4   : > { %3612 = vmatpush3.bf16.msra.mxu1 %v3816_v62 }
 0xfc5   : > { %3625 = vmatprep.subr.bf16.mxu1 %v4371_v8 }
0x108e   : > { %v2826_v63 = vpop.f32.mrb[24].mxu1 }
0x108f   : > { %v2976_v47 = vpack.c.bf16 %v2826_v63, %v2826_v63  ;;  %v3598_v27 = vpop.f32.mrb[25].mxu1 }
0x1090   : > { %v2972_v56 = vpop.f32.mrb[28].mxu0 }
0x1091   : > { %3622 = vmatmul.mubr.msk.bf16.vlgmr.msra.gmra.mrb[32].mxu0 %vm813_vm0, %v2976_v47  ;;  %v3608_v6 = vpop.f32.mrb[29].mxu0  ;;  %v3088_v17 = vpack.c.bf16 %v2972_v56, %v2972_v56 }
0x1092   : > { %v2899_v9 = vpop.f32.mrb[26].mxu1 }
0x1093   : > { %v2977_v16 = vpack.c.bf16 %v2899_v9, %v2899_v9  ;;  %v3603_v11 = vpop.f32.mrb[27].mxu1 }
0x1095   : > { %3614 = vmatmul.mubr.msk.bf16.vlgmr.msra.gmra.mrb[28].mxu1 %vm813_vm0, %v2977_v16 }
0x1096   : > { %3626 = vmatpush3.bf16.msra.mxu1 %v3818_v10  ;;  %3629 = vmatprep.mubr.msk.bf16.mxu1 %vm4372_vm1, %v4371_v8 }
0x1097   : > { %3627 = vmatprep.subr.bf16.mxu1 %v4371_v8  ;;  %v3455_v8 = vld [vmem:[%s5534_s17] ss:$0 sm:$0xff] }
0x109a   : > { %3628 = vmatpush3.bf16.msra.mxu1 %v3819_v19 }
0x109d   : > { %3630 = vmatmul.mubr.msk.bf16.vlgmr.msra.gmra.mrb[32].mxu1 %vm813_vm0, %v3088_v17 }
0x1164   : > { %v3082_v32 = vpop.f32.mrb[32].mxu0 }
0x1165   : > { %v3623_v31 = vpop.f32.mrb[33].mxu0 }
0x1166   : > { %v3085_v2 = vpop.f32.mrb[34].mxu0 }
0x1167   : > { %v3624_v3 = vpop.f32.mrb[35].mxu0 }
0x1168   : > { %v3027_v20 = vpop.f32.mrb[28].mxu1 }
0x1169   : > { %v3083_v21 = vadd.f32 %v3082_v32, %v3027_v20  ;;  %v3615_v23 = vpop.f32.mrb[29].mxu1 }
0x116a   : > { %v3030_v7 = vpop.f32.mrb[30].mxu1 }
0x116b   : > { %v3616_v42 = vpop.f32.mrb[31].mxu1 }
0x1170   : > { %v3138_v25 = vpop.f32.mrb[32].mxu1 }
0x1171   : > { %v3144_v29 = vadd.f32 %v3138_v25, %v3083_v21  ;;  %v3631_v30 = vpop.f32.mrb[33].mxu1 }
0x1172   : > { %v3141_v35 = vpop.f32.mrb[34].mxu1 }
0x1173   : > { %v3151_v36 = vadd.f32 %v3455_v8, %v3144_v29  ;;  %v3632_v37 = vpop.f32.mrb[35].mxu1 }
0x1175   : > { %v3152_v52 = vadd.f32 %v3151_v36, %v5317_v43 }
0x1177   : > { %3153 = vst.msk [vmem:[%s766_s18] sm:$0xff] %vm813_vm0, %v3152_v52 }
0x1178   : > { %4277 = shalt.err (!%p4274_p5)
}
0x1179   : > { %s4278_s6 = scalar_lea.hbm %s5384_s20, 128  ;;  %s4282_s19 = scalar_lea.hbm %s5535_s16, 256 }
0x117a   : > { %p4279_p7 = scmp.ne.s32.totalorder %s5384_s20, %s4278_s6  ;;  %p4283_p4 = scmp.lt.u32.totalorder %s5384_s20, %s5535_s16 }
0x117b   : > { %p4284_p6 = scmp.lt.u32.totalorder %s4282_s19, %s4278_s6  ;;  %p4286_p10 = scmp.lt.u32.totalorder %s4278_s6, %s5384_s20 }
0x117c   : > { %p4280_p8 = pnand %p4279_p7, %p5536_p11 }
0x117d   : > { %p4285_p3 = por %p4284_p6, %p4283_p4 }
0x117e   : > { %p4281_p9 = pneg %p4280_p8 }
0x117f   : > { %p4287_p2 = por %p4286_p10, %p4285_p3 }
0x1181   : > { %p4288_p13 = pnand %p4287_p2, %p4281_p9 }
0x1183   : > { %4291 = shalt.err (!%p4288_p13)
}
0x1184   : > { %3679 = dma.vmem_to_hbm [thread:$0]  (%p5536_p11), %s5386_s30, 128, %s5384_s20, %s3155_s23  }
0x1185 PF: > { %s3180_s26 = sand.u32 1, %s4342_s24   ;;  %p5537_p12 = scmp.ne.s32.totalorder %s5503_s28, 0 }
0x1186   : > { %p5538_p1 = scmp.ge.s32.totalorder %s4354_s27, 2  ;;  %s3181_s18 = scalar_lea.sflag [#allocation4], %s3180_s26 }
0x1188   : > { %p3723_p0 = pnand %p5538_p1, %p5537_p12 }
0x118a   : > { %4337 = dma.done.wait (!%p3723_p0), %s3181_s18, 128  }
0x118b   : > { %4339 = vsyncadd (!%p3723_p0), %s3181_s18, 4294967168  ;;  %s5539_s27 = sld [smem:[#allocation34_spill]]  ;;  %s5540_s5 = sld [smem:[#allocation32_spill]] }
0x118c   : > { %s5541_s26 = sld [smem:[#allocation35_spill]]  ;;  %s5542_s24 = smov %s4346_s25 }
0x1191   : > { %p38_p5 = scmp.ge.s32.totalorder %s5539_s27, 4   ;;  %s5543_s25 = smov %s5540_s5 }
0x1193   :  { %40 = sbr.rel (!%p38_p5) target bundleno = 28 (0x1c), region = 197 }
0x119a   :  { %3186 = vsyncpa [#allocation3], 1 }
0x119b   :  { %3188 = vsyncpa [#allocation3 + $0x1], 1 }
0x119c   :  { %3189 = vsyncpa [#allocation6], 1 }
0x119d   :  { %3191 = vsyncpa [#allocation6 + $0x1], 1 }
0x119e   :  { %3192 = vsyncpa [#allocation9], 1 }
0x119f   :  { %3193 = vsyncpa [#allocation12], 1 }
0x11a0   :  { %3194 = vsyncpa [#allocation15], 1 }
0x11a1   :  { %3195 = vsyncpa [#allocation18], 1 }
0x11a2   :  { %3196 = vsyncpa [#allocation21], 1 }
0x11a3   :  { %3197 = vsyncpa [#allocation4], 1 }
0x11a4   :  { %3199 = vsyncpa [#allocation4 + $0x1], 1 }

</bundles_post_ra>
